<compile_context>
chip_gen: v5e
topology: v5e:2x2
jax: 0.10.0
libtpu: 0.0.40
codegen_flags: <defaults>
</compile_context>

<pallas_src>
import numpy as np
import jax
import jax.numpy as jnp
from jax import lax
from jax.experimental import pallas as pl
from jax.experimental.pallas import tpu as pltpu

BN_EPS = 1e-5
_LANE = 128


def _round8(x):
    return ((x + 7) // 8) * 8


# ------------------------- parameter slab layout ------------------------------
def param_layout(D):
    """Static layout of the single parameter slab (rows x lanes, f32).

    Every parameter sits at an 8-row (sublane-tile) aligned offset so in-kernel
    reads are aligned static slices; the whole parameter set is ONE DMA."""
    entries = [("lstm_whh", D, 4 * D),   # (D, 4D) lane-dense recurrence weight
               ("lstm_wih", 1, 4 * D),   # input weight (input feature dim is 1)
               ("lstm_b", 1, 4 * D)]     # b_ih + b_hh
    cg_dims = [(D, 2 * D), (2 * D, 2 * D), (2 * D, D)]
    for blk in range(2):
        for br in ("s", "c"):
            for l, (di, do) in enumerate(cg_dims, start=1):
                entries.append((f"cg{blk}_{br}_w{l}", di, do))
                entries.append((f"cg{blk}_{br}_b{l}", 1, do))
    for l, (di, do) in enumerate([(D, 2 * D), (2 * D, D)], start=1):
        entries.append((f"fin_w{l}", di, do))
        entries.append((f"fin_b{l}", 1, do))
    entries.append(("fin_w3t", 1, D))    # final (D,1) weight stored transposed
    entries.append(("fin_b3", 1, 1))

    layout, off, max_do = {}, 0, 0
    for name, di, do in entries:
        layout[name] = (off, di, do)
        off += _round8(di)
        max_do = max(max_do, do)
    lanes = ((max_do + _LANE - 1) // _LANE) * _LANE
    return layout, off, lanes


def flatten_params(params):
    wih, whh, b = params["lstm"]
    named = {"lstm_whh": whh, "lstm_wih": wih, "lstm_b": b}
    for blk in range(2):
        ws = params["cg"][blk]
        k = 0
        for br in ("s", "c"):
            for l in range(1, 4):
                named[f"cg{blk}_{br}_w{l}"] = ws[k]; k += 1
                named[f"cg{blk}_{br}_b{l}"] = ws[k]; k += 1
    fw = params["final"]
    named["fin_w1"], named["fin_b1"] = fw[0], fw[1]
    named["fin_w2"], named["fin_b2"] = fw[2], fw[3]
    named["fin_w3t"], named["fin_b3"] = fw[4].T, fw[5]
    return named


def pack_params(params, D):
    """Pack all parameters into one zero-padded (rows, lanes) f32 slab (host side)."""
    layout, rows, lanes = param_layout(D)
    named = flatten_params(params)
    slab = np.zeros((rows, lanes), np.float32)
    for name, (off, di, do) in layout.items():
        slab[off:off + di, :do] = np.asarray(named[name], np.float32).reshape(di, do)
    return jnp.asarray(slab)


# --------------------------- fused decoder kernel ----------------------------
def make_decoder_fn(B, T, D):
    layout, _, _ = param_layout(D)

    def getp(p_ref, name):
        off, di, do = layout[name]
        return p_ref[off:off + di, 0:do]

    def mlp3(p_ref, x, pre):
        # Linear+ReLU, Linear+ReLU, Linear (BatchNorm folded into the weights).
        h = jnp.maximum(jnp.dot(x, getp(p_ref, pre + "w1"),
                                preferred_element_type=jnp.float32)
                        + getp(p_ref, pre + "b1"), 0.0)
        h = jnp.maximum(jnp.dot(h, getp(p_ref, pre + "w2"),
                                preferred_element_type=jnp.float32)
                        + getp(p_ref, pre + "b2"), 0.0)
        return jnp.dot(h, getp(p_ref, pre + "w3"),
                       preferred_element_type=jnp.float32) + getp(p_ref, pre + "b3")

    def kernel(s_ref, c_ref, p_ref, out_ref, xp_ref, h_ref):
        # inputs : s (T*B, 1) time-major, c (B, D), p (rows, 128) parameter slab
        # output : out (B*T, 1)  (row r = b*T + t)
        # scratch: xp (T*B, 4D) gate input projections, h (B*T, D) hidden states

        # ---------------- LSTM ----------------
        wih = getp(p_ref, "lstm_wih")        # (1, 4D)
        bia = getp(p_ref, "lstm_b")          # (1, 4D)
        whh = getp(p_ref, "lstm_whh")        # (D, 4D)  lane-dense, read once

        # All gate input projections in one lane-dense broadcast (input dim = 1).
        xp_ref[...] = s_ref[...] * wih + bia                       # (T*B, 4D)

        def step(t, carry):
            h, cc = carry
            # one fused (B, D) @ (D, 4D) MXU pass on the serial chain
            gates = xp_ref[pl.ds(t * B, B), :] + jnp.dot(
                h, whh, preferred_element_type=jnp.float32)        # (B, 4D)
            # sigmoid = 0.5*(tanh(x/2)+1): two EUP pushes on the full 128-lane row
            sg = 0.5 * (jnp.tanh(0.5 * gates) + 1.0)
            th = jnp.tanh(gates)
            cc = sg[:, D:2 * D] * cc + sg[:, 0:D] * th[:, 2 * D:3 * D]
            h = sg[:, 3 * D:4 * D] * jnp.tanh(cc)
            for b in range(B):               # store batch-major: row b*T + t
                h_ref[pl.ds(b * T + t, 1), :] = h[b:b + 1, :]
            return (h, cc)

        z = jnp.zeros((B, D), jnp.float32)
        lax.fori_loop(0, T, step, (z, z), unroll=True)

        # ---------------- MCGBlock: 2 CG blocks with running means ------------
        rs = h_ref[...]                      # (B*T, D), row r = b*T + t
        rc = c_ref[...]                      # (B, D)
        for blk in range(2):
            c3 = mlp3(p_ref, rc, f"cg{blk}_c_")                   # (B, D)
            h3 = mlp3(p_ref, rs, f"cg{blk}_s_")                   # (B*T, D)
            # context broadcast over T: pure sublane broadcast on a (B,T,D) view
            s3 = h3.reshape(B, T, D) * c3[:, None, :]
            agg = jnp.max(s3, axis=1)                              # 'max' pool (XLU)
            s_out = s3.reshape(B * T, D)
            k = float(blk + 1)
            inv = 1.0 / (k + 1.0)
            rs = (rs * k + s_out) * inv                            # running mean s
            rc = (rc * k + agg) * inv                              # running mean c

        # ---------------- final MLP head (D -> 2D -> D -> 1) ------------------
        h1 = jnp.maximum(jnp.dot(rs, getp(p_ref, "fin_w1"),
                                 preferred_element_type=jnp.float32)
                         + getp(p_ref, "fin_b1"), 0.0)
        h2 = jnp.maximum(jnp.dot(h1, getp(p_ref, "fin_w2"),
                                 preferred_element_type=jnp.float32)
                         + getp(p_ref, "fin_b2"), 0.0)
        # last layer has dout = 1: VPU multiply + lane reduce (no 1-column matmul)
        y = jnp.sum(h2 * getp(p_ref, "fin_w3t"), axis=1, keepdims=True) \
            + getp(p_ref, "fin_b3")
        out_ref[...] = y                                           # single store

    vmem = pl.BlockSpec(memory_space=pltpu.MemorySpace.VMEM)
    call = pl.pallas_call(
        kernel,
        out_shape=jax.ShapeDtypeStruct((B * T, 1), jnp.float32),
        in_specs=[vmem, vmem, vmem],
        out_specs=vmem,
        scratch_shapes=[pltpu.VMEM((T * B, 4 * D), jnp.float32),
                        pltpu.VMEM((B * T, D), jnp.float32)],
    )

    def forward(s, c, slab):
        # time-major (T*B, 1) view of s so the gate-input matrix is one
        # lane-dense block (tiny host-side transpose of an input, not an
        # intermediate).
        s_tm = jnp.transpose(s, (1, 0, 2)).reshape(T * B, 1)
        y = call(s_tm, c, slab)                    # (B*T, 1), row r = b*T + t
        return y.reshape(B, T, 1)                  # free metadata reshape

    return forward


# ----------------------- parameter init (deterministic) ----------------------
def _init_linear(key, din, dout):
    kw, kb = jax.random.split(key)
    bound = 1.0 / np.sqrt(din)
    w = jax.random.uniform(kw, (din, dout), jnp.float32, -bound, bound)
    b = jax.random.uniform(kb, (1, dout), jnp.float32, -bound, bound)
    return w, b


def _fold_bn(w, b):
    # eval-mode BatchNorm1d with default stats: (x - 0)/sqrt(1 + eps) * 1 + 0
    scale = 1.0 / np.sqrt(1.0 + BN_EPS)
    return w * scale, b * scale


def _init_mlp3(key, dims, bn_after):
    ks = jax.random.split(key, 3)
    out = []
    for li in range(3):
        w, b = _init_linear(ks[li], dims[li], dims[li + 1])
        if bn_after[li]:
            w, b = _fold_bn(w, b)
        out += [w, b]
    return out


def init_decoder_params(key, D):
    keys = jax.random.split(key, 8)
    bound = 1.0 / np.sqrt(D)
    wih = jax.random.uniform(keys[0], (1, 4 * D), jnp.float32, -bound, bound)
    whh = jax.random.uniform(keys[1], (D, 4 * D), jnp.float32, -bound, bound)
    b_ih = jax.random.uniform(keys[2], (1, 4 * D), jnp.float32, -bound, bound)
    b_hh = jax.random.uniform(keys[3], (1, 4 * D), jnp.float32, -bound, bound)
    lstm = (wih, whh, b_ih + b_hh)

    dims_cg = [D, 2 * D, 2 * D, D]
    cg_blocks = []
    for bi in range(2):
        s_w = _init_mlp3(keys[4 + bi], dims_cg, [True, True, False])
        c_w = _init_mlp3(jax.random.fold_in(keys[4 + bi], 7), dims_cg,
                         [True, True, False])
        cg_blocks.append(tuple(s_w + c_w))

    final = tuple(_init_mlp3(keys[6], [D, 2 * D, D, 1], [True, True, False]))
    return {"lstm": lstm, "cg": cg_blocks, "final": final}


# ---------------------------- pure-JAX reference -----------------------------
def reference_forward(s, c, params):
    B, T, _ = s.shape
    wih, whh, b = params["lstm"]
    D = whh.shape[0]
    hp = jax.lax.Precision.HIGHEST

    def lstm_step(carry, x_t):
        h, cc = carry
        gates = x_t * wih + jnp.dot(h, whh, precision=hp) + b
        i = jax.nn.sigmoid(gates[:, 0 * D:1 * D])
        f = jax.nn.sigmoid(gates[:, 1 * D:2 * D])
        g = jnp.tanh(gates[:, 2 * D:3 * D])
        o = jax.nn.sigmoid(gates[:, 3 * D:4 * D])
        cc = f * cc + i * g
        h = o * jnp.tanh(cc)
        return (h, cc), h

    (_, _), hs = lax.scan(lstm_step,
                          (jnp.zeros((B, D)), jnp.zeros((B, D))),
                          jnp.transpose(s, (1, 0, 2)))
    h = jnp.transpose(hs, (1, 0, 2))                 # (B, T, D)

    def mlp3(x, w):
        w1, b1, w2, b2, w3, b3 = w
        x = jnp.maximum(jnp.dot(x, w1, precision=hp) + b1, 0.0)
        x = jnp.maximum(jnp.dot(x, w2, precision=hp) + b2, 0.0)
        return jnp.dot(x, w3, precision=hp) + b3

    rs, rc = h, c
    for i, w in enumerate(params["cg"], start=1):
        sw, cw = w[:6], w[6:]
        c_out = mlp3(rc, cw)                                        # (B, D)
        s_feat = mlp3(rs.reshape(B * T, D), sw).reshape(B, T, D)
        s_out = s_feat * c_out[:, None, :]
        agg = jnp.max(s_out, axis=1)
        rs = (rs * i + s_out) / (i + 1)
        rc = (rc * i + agg) / (i + 1)
    out = mlp3(rs.reshape(B * T, D), params["final"])
    return out.reshape(B, T, 1)


if __name__ == "__main__":
    B, T, D = 2, 8, 32                     # batch, seq len, dim_context
    key = jax.random.PRNGKey(0)
    k_s, k_c, k_p = jax.random.split(key, 3)
    s = jax.random.normal(k_s, (B, T, 1), jnp.float32)
    c = jax.random.normal(k_c, (B, D), jnp.float32)
    params = init_decoder_params(k_p, D)
    slab = pack_params(params, D)          # single parameter DMA slab

    fwd = jax.jit(make_decoder_fn(B, T, D))
    out = jax.block_until_ready(fwd(s, c, slab))
    assert out.shape == (B, T, 1)

    ref = jax.block_until_ready(reference_forward(s, c, params))
    np.testing.assert_allclose(np.asarray(out), np.asarray(ref),
                               rtol=1e-3, atol=5e-4)
    print("KERNEL_OK")
</pallas_src>

<mosaic_0001>
module attributes {stable_mosaic.version = 11 : i64} {
  func.func @kernel(%arg0: memref<16x1xf32, #tpu.memory_space<vmem>>, %arg1: memref<2x32xf32, #tpu.memory_space<vmem>>, %arg2: memref<912x128xf32, #tpu.memory_space<vmem>>, %arg3: memref<16x1xf32, #tpu.memory_space<vmem>>, %arg4: memref<16x128xf32, #tpu.memory_space<vmem>>, %arg5: memref<16x32xf32, #tpu.memory_space<vmem>>) attributes {dimension_semantics = [], scalar_prefetch = 0 : i64, scratch_operands = 2 : i64, tpu.core_type = #tpu.core_type<tc>} {
    %c32 = arith.constant 32 : index
    %c0 = arith.constant 0 : index
    %0 = vector.load %arg2[%c32, %c0] : memref<912x128xf32, #tpu.memory_space<vmem>>, vector<1x128xf32>
    %c40 = arith.constant 40 : index
    %c0_0 = arith.constant 0 : index
    %1 = vector.load %arg2[%c40, %c0_0] : memref<912x128xf32, #tpu.memory_space<vmem>>, vector<1x128xf32>
    %c0_1 = arith.constant 0 : index
    %c0_2 = arith.constant 0 : index
    %2 = vector.load %arg2[%c0_1, %c0_2] : memref<912x128xf32, #tpu.memory_space<vmem>>, vector<32x128xf32>
    %c0_3 = arith.constant 0 : index
    %c0_4 = arith.constant 0 : index
    %3 = vector.load %arg0[%c0_3, %c0_4] : memref<16x1xf32, #tpu.memory_space<vmem>>, vector<16x1xf32>
    %4 = vector.broadcast %3 : vector<16x1xf32> to vector<16x128xf32>
    %5 = vector.broadcast %0 : vector<1x128xf32> to vector<16x128xf32>
    %6 = arith.mulf %4, %5 : vector<16x128xf32>
    %7 = vector.broadcast %1 : vector<1x128xf32> to vector<16x128xf32>
    %8 = arith.addf %6, %7 : vector<16x128xf32>
    %c0_5 = arith.constant 0 : index
    %c0_6 = arith.constant 0 : index
    %9 = vector.load %arg4[%c0_5, %c0_6] : memref<16x128xf32, #tpu.memory_space<vmem>>, vector<16x128xf32>
    tpu.vector_store %arg4[%c0_5, %c0_6], %8 {strides = array<i32>} : memref<16x128xf32, #tpu.memory_space<vmem>>, vector<16x128xf32>,
    %cst = arith.constant 0.000000e+00 : f32
    %10 = vector.broadcast %cst : f32 to vector<2x32xf32>
    %c0_i32 = arith.constant 0 : i32
    %c2_i32 = arith.constant 2 : i32
    %11 = arith.muli %c0_i32, %c2_i32 : i32
    %12 = arith.index_cast %11 : i32 to index
    %c0_7 = arith.constant 0 : index
    %13 = vector.load %arg4[%12, %c0_7] : memref<16x128xf32, #tpu.memory_space<vmem>>, vector<2x128xf32>
    %cst_8 = arith.constant dense<0.000000e+00> : vector<2x128xf32>
    %14 = tpu.matmul %10, %2, %cst_8 {dimension_numbers = #tpu.dot_dimension_numbers<[1], [0], [0], [1], [0, 0, 1, 1], [], []>} : vector<2x32xf32>, vector<32x128xf32>, vector<2x128xf32> -> vector<2x128xf32>
    %15 = arith.addf %13, %14 : vector<2x128xf32>
    %cst_9 = arith.constant 5.000000e-01 : f32
    %16 = vector.broadcast %cst_9 : f32 to vector<2x128xf32>
    %17 = arith.mulf %16, %15 : vector<2x128xf32>
    %18 = math.tanh %17 : vector<2x128xf32>
    %cst_10 = arith.constant 1.000000e+00 : f32
    %19 = vector.broadcast %cst_10 : f32 to vector<2x128xf32>
    %20 = arith.addf %18, %19 : vector<2x128xf32>
    %cst_11 = arith.constant 5.000000e-01 : f32
    %21 = vector.broadcast %cst_11 : f32 to vector<2x128xf32>
    %22 = arith.mulf %21, %20 : vector<2x128xf32>
    %23 = math.tanh %15 : vector<2x128xf32>
    %24 = vector.extract_strided_slice %22 {offsets = [0, 32], sizes = [2, 32], strides = [1, 1]} : vector<2x128xf32> to vector<2x32xf32>
    %25 = arith.mulf %24, %10 : vector<2x32xf32>
    %26 = vector.extract_strided_slice %22 {offsets = [0, 0], sizes = [2, 32], strides = [1, 1]} : vector<2x128xf32> to vector<2x32xf32>
    %27 = vector.extract_strided_slice %23 {offsets = [0, 64], sizes = [2, 32], strides = [1, 1]} : vector<2x128xf32> to vector<2x32xf32>
    %28 = arith.mulf %26, %27 : vector<2x32xf32>
    %29 = arith.addf %25, %28 : vector<2x32xf32>
    %30 = vector.extract_strided_slice %22 {offsets = [0, 96], sizes = [2, 32], strides = [1, 1]} : vector<2x128xf32> to vector<2x32xf32>
    %31 = math.tanh %29 : vector<2x32xf32>
    %32 = arith.mulf %30, %31 : vector<2x32xf32>
    %33 = vector.extract_strided_slice %32 {offsets = [0, 0], sizes = [1, 32], strides = [1, 1]} : vector<2x32xf32> to vector<1x32xf32>
    %c0_i32_12 = arith.constant 0 : i32
    %34 = arith.addi %c0_i32_12, %c0_i32 : i32
    %35 = arith.index_cast %34 : i32 to index
    %c0_13 = arith.constant 0 : index
    %36 = vector.load %arg5[%35, %c0_13] : memref<16x32xf32, #tpu.memory_space<vmem>>, vector<1x32xf32>
    tpu.vector_store %arg5[%35, %c0_13], %33 {strides = array<i32>} : memref<16x32xf32, #tpu.memory_space<vmem>>, vector<1x32xf32>,
    %37 = vector.extract_strided_slice %32 {offsets = [1, 0], sizes = [1, 32], strides = [1, 1]} : vector<2x32xf32> to vector<1x32xf32>
    %c8_i32 = arith.constant 8 : i32
    %38 = arith.addi %c8_i32, %c0_i32 : i32
    %39 = arith.index_cast %38 : i32 to index
    %c0_14 = arith.constant 0 : index
    %40 = vector.load %arg5[%39, %c0_14] : memref<16x32xf32, #tpu.memory_space<vmem>>, vector<1x32xf32>
    tpu.vector_store %arg5[%39, %c0_14], %37 {strides = array<i32>} : memref<16x32xf32, #tpu.memory_space<vmem>>, vector<1x32xf32>,
    %c1_i32 = arith.constant 1 : i32
    %c2_i32_15 = arith.constant 2 : i32
    %41 = arith.muli %c1_i32, %c2_i32_15 : i32
    %42 = arith.index_cast %41 : i32 to index
    %c0_16 = arith.constant 0 : index
    %43 = vector.load %arg4[%42, %c0_16] : memref<16x128xf32, #tpu.memory_space<vmem>>, vector<2x128xf32>
    %cst_17 = arith.constant dense<0.000000e+00> : vector<2x128xf32>
    %44 = tpu.matmul %32, %2, %cst_17 {dimension_numbers = #tpu.dot_dimension_numbers<[1], [0], [0], [1], [0, 0, 1, 1], [], []>} : vector<2x32xf32>, vector<32x128xf32>, vector<2x128xf32> -> vector<2x128xf32>
    %45 = arith.addf %43, %44 : vector<2x128xf32>
    %cst_18 = arith.constant 5.000000e-01 : f32
    %46 = vector.broadcast %cst_18 : f32 to vector<2x128xf32>
    %47 = arith.mulf %46, %45 : vector<2x128xf32>
    %48 = math.tanh %47 : vector<2x128xf32>
    %cst_19 = arith.constant 1.000000e+00 : f32
    %49 = vector.broadcast %cst_19 : f32 to vector<2x128xf32>
    %50 = arith.addf %48, %49 : vector<2x128xf32>
    %cst_20 = arith.constant 5.000000e-01 : f32
    %51 = vector.broadcast %cst_20 : f32 to vector<2x128xf32>
    %52 = arith.mulf %51, %50 : vector<2x128xf32>
    %53 = math.tanh %45 : vector<2x128xf32>
    %54 = vector.extract_strided_slice %52 {offsets = [0, 32], sizes = [2, 32], strides = [1, 1]} : vector<2x128xf32> to vector<2x32xf32>
    %55 = arith.mulf %54, %29 : vector<2x32xf32>
    %56 = vector.extract_strided_slice %52 {offsets = [0, 0], sizes = [2, 32], strides = [1, 1]} : vector<2x128xf32> to vector<2x32xf32>
    %57 = vector.extract_strided_slice %53 {offsets = [0, 64], sizes = [2, 32], strides = [1, 1]} : vector<2x128xf32> to vector<2x32xf32>
    %58 = arith.mulf %56, %57 : vector<2x32xf32>
    %59 = arith.addf %55, %58 : vector<2x32xf32>
    %60 = vector.extract_strided_slice %52 {offsets = [0, 96], sizes = [2, 32], strides = [1, 1]} : vector<2x128xf32> to vector<2x32xf32>
    %61 = math.tanh %59 : vector<2x32xf32>
    %62 = arith.mulf %60, %61 : vector<2x32xf32>
    %63 = vector.extract_strided_slice %62 {offsets = [0, 0], sizes = [1, 32], strides = [1, 1]} : vector<2x32xf32> to vector<1x32xf32>
    %c0_i32_21 = arith.constant 0 : i32
    %64 = arith.addi %c0_i32_21, %c1_i32 : i32
    %65 = arith.index_cast %64 : i32 to index
    %c0_22 = arith.constant 0 : index
    %66 = vector.load %arg5[%65, %c0_22] : memref<16x32xf32, #tpu.memory_space<vmem>>, vector<1x32xf32>
    tpu.vector_store %arg5[%65, %c0_22], %63 {strides = array<i32>} : memref<16x32xf32, #tpu.memory_space<vmem>>, vector<1x32xf32>,
    %67 = vector.extract_strided_slice %62 {offsets = [1, 0], sizes = [1, 32], strides = [1, 1]} : vector<2x32xf32> to vector<1x32xf32>
    %c8_i32_23 = arith.constant 8 : i32
    %68 = arith.addi %c8_i32_23, %c1_i32 : i32
    %69 = arith.index_cast %68 : i32 to index
    %c0_24 = arith.constant 0 : index
    %70 = vector.load %arg5[%69, %c0_24] : memref<16x32xf32, #tpu.memory_space<vmem>>, vector<1x32xf32>
    tpu.vector_store %arg5[%69, %c0_24], %67 {strides = array<i32>} : memref<16x32xf32, #tpu.memory_space<vmem>>, vector<1x32xf32>,
    %c2_i32_25 = arith.constant 2 : i32
    %c2_i32_26 = arith.constant 2 : i32
    %71 = arith.muli %c2_i32_25, %c2_i32_26 : i32
    %72 = arith.index_cast %71 : i32 to index
    %c0_27 = arith.constant 0 : index
    %73 = vector.load %arg4[%72, %c0_27] : memref<16x128xf32, #tpu.memory_space<vmem>>, vector<2x128xf32>
    %cst_28 = arith.constant dense<0.000000e+00> : vector<2x128xf32>
    %74 = tpu.matmul %62, %2, %cst_28 {dimension_numbers = #tpu.dot_dimension_numbers<[1], [0], [0], [1], [0, 0, 1, 1], [], []>} : vector<2x32xf32>, vector<32x128xf32>, vector<2x128xf32> -> vector<2x128xf32>
    %75 = arith.addf %73, %74 : vector<2x128xf32>
    %cst_29 = arith.constant 5.000000e-01 : f32
    %76 = vector.broadcast %cst_29 : f32 to vector<2x128xf32>
    %77 = arith.mulf %76, %75 : vector<2x128xf32>
    %78 = math.tanh %77 : vector<2x128xf32>
    %cst_30 = arith.constant 1.000000e+00 : f32
    %79 = vector.broadcast %cst_30 : f32 to vector<2x128xf32>
    %80 = arith.addf %78, %79 : vector<2x128xf32>
    %cst_31 = arith.constant 5.000000e-01 : f32
    %81 = vector.broadcast %cst_31 : f32 to vector<2x128xf32>
    %82 = arith.mulf %81, %80 : vector<2x128xf32>
    %83 = math.tanh %75 : vector<2x128xf32>
    %84 = vector.extract_strided_slice %82 {offsets = [0, 32], sizes = [2, 32], strides = [1, 1]} : vector<2x128xf32> to vector<2x32xf32>
    %85 = arith.mulf %84, %59 : vector<2x32xf32>
    %86 = vector.extract_strided_slice %82 {offsets = [0, 0], sizes = [2, 32], strides = [1, 1]} : vector<2x128xf32> to vector<2x32xf32>
    %87 = vector.extract_strided_slice %83 {offsets = [0, 64], sizes = [2, 32], strides = [1, 1]} : vector<2x128xf32> to vector<2x32xf32>
    %88 = arith.mulf %86, %87 : vector<2x32xf32>
    %89 = arith.addf %85, %88 : vector<2x32xf32>
    %90 = vector.extract_strided_slice %82 {offsets = [0, 96], sizes = [2, 32], strides = [1, 1]} : vector<2x128xf32> to vector<2x32xf32>
    %91 = math.tanh %89 : vector<2x32xf32>
    %92 = arith.mulf %90, %91 : vector<2x32xf32>
    %93 = vector.extract_strided_slice %92 {offsets = [0, 0], sizes = [1, 32], strides = [1, 1]} : vector<2x32xf32> to vector<1x32xf32>
    %c0_i32_32 = arith.constant 0 : i32
    %94 = arith.addi %c0_i32_32, %c2_i32_25 : i32
    %95 = arith.index_cast %94 : i32 to index
    %c0_33 = arith.constant 0 : index
    %96 = vector.load %arg5[%95, %c0_33] : memref<16x32xf32, #tpu.memory_space<vmem>>, vector<1x32xf32>
    tpu.vector_store %arg5[%95, %c0_33], %93 {strides = array<i32>} : memref<16x32xf32, #tpu.memory_space<vmem>>, vector<1x32xf32>,
    %97 = vector.extract_strided_slice %92 {offsets = [1, 0], sizes = [1, 32], strides = [1, 1]} : vector<2x32xf32> to vector<1x32xf32>
    %c8_i32_34 = arith.constant 8 : i32
    %98 = arith.addi %c8_i32_34, %c2_i32_25 : i32
    %99 = arith.index_cast %98 : i32 to index
    %c0_35 = arith.constant 0 : index
    %100 = vector.load %arg5[%99, %c0_35] : memref<16x32xf32, #tpu.memory_space<vmem>>, vector<1x32xf32>
    tpu.vector_store %arg5[%99, %c0_35], %97 {strides = array<i32>} : memref<16x32xf32, #tpu.memory_space<vmem>>, vector<1x32xf32>,
    %c3_i32 = arith.constant 3 : i32
    %c2_i32_36 = arith.constant 2 : i32
    %101 = arith.muli %c3_i32, %c2_i32_36 : i32
    %102 = arith.index_cast %101 : i32 to index
    %c0_37 = arith.constant 0 : index
    %103 = vector.load %arg4[%102, %c0_37] : memref<16x128xf32, #tpu.memory_space<vmem>>, vector<2x128xf32>
    %cst_38 = arith.constant dense<0.000000e+00> : vector<2x128xf32>
    %104 = tpu.matmul %92, %2, %cst_38 {dimension_numbers = #tpu.dot_dimension_numbers<[1], [0], [0], [1], [0, 0, 1, 1], [], []>} : vector<2x32xf32>, vector<32x128xf32>, vector<2x128xf32> -> vector<2x128xf32>
    %105 = arith.addf %103, %104 : vector<2x128xf32>
    %cst_39 = arith.constant 5.000000e-01 : f32
    %106 = vector.broadcast %cst_39 : f32 to vector<2x128xf32>
    %107 = arith.mulf %106, %105 : vector<2x128xf32>
    %108 = math.tanh %107 : vector<2x128xf32>
    %cst_40 = arith.constant 1.000000e+00 : f32
    %109 = vector.broadcast %cst_40 : f32 to vector<2x128xf32>
    %110 = arith.addf %108, %109 : vector<2x128xf32>
    %cst_41 = arith.constant 5.000000e-01 : f32
    %111 = vector.broadcast %cst_41 : f32 to vector<2x128xf32>
    %112 = arith.mulf %111, %110 : vector<2x128xf32>
    %113 = math.tanh %105 : vector<2x128xf32>
    %114 = vector.extract_strided_slice %112 {offsets = [0, 32], sizes = [2, 32], strides = [1, 1]} : vector<2x128xf32> to vector<2x32xf32>
    %115 = arith.mulf %114, %89 : vector<2x32xf32>
    %116 = vector.extract_strided_slice %112 {offsets = [0, 0], sizes = [2, 32], strides = [1, 1]} : vector<2x128xf32> to vector<2x32xf32>
    %117 = vector.extract_strided_slice %113 {offsets = [0, 64], sizes = [2, 32], strides = [1, 1]} : vector<2x128xf32> to vector<2x32xf32>
    %118 = arith.mulf %116, %117 : vector<2x32xf32>
    %119 = arith.addf %115, %118 : vector<2x32xf32>
    %120 = vector.extract_strided_slice %112 {offsets = [0, 96], sizes = [2, 32], strides = [1, 1]} : vector<2x128xf32> to vector<2x32xf32>
    %121 = math.tanh %119 : vector<2x32xf32>
    %122 = arith.mulf %120, %121 : vector<2x32xf32>
    %123 = vector.extract_strided_slice %122 {offsets = [0, 0], sizes = [1, 32], strides = [1, 1]} : vector<2x32xf32> to vector<1x32xf32>
    %c0_i32_42 = arith.constant 0 : i32
    %124 = arith.addi %c0_i32_42, %c3_i32 : i32
    %125 = arith.index_cast %124 : i32 to index
    %c0_43 = arith.constant 0 : index
    %126 = vector.load %arg5[%125, %c0_43] : memref<16x32xf32, #tpu.memory_space<vmem>>, vector<1x32xf32>
    tpu.vector_store %arg5[%125, %c0_43], %123 {strides = array<i32>} : memref<16x32xf32, #tpu.memory_space<vmem>>, vector<1x32xf32>,
    %127 = vector.extract_strided_slice %122 {offsets = [1, 0], sizes = [1, 32], strides = [1, 1]} : vector<2x32xf32> to vector<1x32xf32>
    %c8_i32_44 = arith.constant 8 : i32
    %128 = arith.addi %c8_i32_44, %c3_i32 : i32
    %129 = arith.index_cast %128 : i32 to index
    %c0_45 = arith.constant 0 : index
    %130 = vector.load %arg5[%129, %c0_45] : memref<16x32xf32, #tpu.memory_space<vmem>>, vector<1x32xf32>
    tpu.vector_store %arg5[%129, %c0_45], %127 {strides = array<i32>} : memref<16x32xf32, #tpu.memory_space<vmem>>, vector<1x32xf32>,
    %c4_i32 = arith.constant 4 : i32
    %c2_i32_46 = arith.constant 2 : i32
    %131 = arith.muli %c4_i32, %c2_i32_46 : i32
    %132 = arith.index_cast %131 : i32 to index
    %c0_47 = arith.constant 0 : index
    %133 = vector.load %arg4[%132, %c0_47] : memref<16x128xf32, #tpu.memory_space<vmem>>, vector<2x128xf32>
    %cst_48 = arith.constant dense<0.000000e+00> : vector<2x128xf32>
    %134 = tpu.matmul %122, %2, %cst_48 {dimension_numbers = #tpu.dot_dimension_numbers<[1], [0], [0], [1], [0, 0, 1, 1], [], []>} : vector<2x32xf32>, vector<32x128xf32>, vector<2x128xf32> -> vector<2x128xf32>
    %135 = arith.addf %133, %134 : vector<2x128xf32>
    %cst_49 = arith.constant 5.000000e-01 : f32
    %136 = vector.broadcast %cst_49 : f32 to vector<2x128xf32>
    %137 = arith.mulf %136, %135 : vector<2x128xf32>
    %138 = math.tanh %137 : vector<2x128xf32>
    %cst_50 = arith.constant 1.000000e+00 : f32
    %139 = vector.broadcast %cst_50 : f32 to vector<2x128xf32>
    %140 = arith.addf %138, %139 : vector<2x128xf32>
    %cst_51 = arith.constant 5.000000e-01 : f32
    %141 = vector.broadcast %cst_51 : f32 to vector<2x128xf32>
    %142 = arith.mulf %141, %140 : vector<2x128xf32>
    %143 = math.tanh %135 : vector<2x128xf32>
    %144 = vector.extract_strided_slice %142 {offsets = [0, 32], sizes = [2, 32], strides = [1, 1]} : vector<2x128xf32> to vector<2x32xf32>
    %145 = arith.mulf %144, %119 : vector<2x32xf32>
    %146 = vector.extract_strided_slice %142 {offsets = [0, 0], sizes = [2, 32], strides = [1, 1]} : vector<2x128xf32> to vector<2x32xf32>
    %147 = vector.extract_strided_slice %143 {offsets = [0, 64], sizes = [2, 32], strides = [1, 1]} : vector<2x128xf32> to vector<2x32xf32>
    %148 = arith.mulf %146, %147 : vector<2x32xf32>
    %149 = arith.addf %145, %148 : vector<2x32xf32>
    %150 = vector.extract_strided_slice %142 {offsets = [0, 96], sizes = [2, 32], strides = [1, 1]} : vector<2x128xf32> to vector<2x32xf32>
    %151 = math.tanh %149 : vector<2x32xf32>
    %152 = arith.mulf %150, %151 : vector<2x32xf32>
    %153 = vector.extract_strided_slice %152 {offsets = [0, 0], sizes = [1, 32], strides = [1, 1]} : vector<2x32xf32> to vector<1x32xf32>
    %c0_i32_52 = arith.constant 0 : i32
    %154 = arith.addi %c0_i32_52, %c4_i32 : i32
    %155 = arith.index_cast %154 : i32 to index
    %c0_53 = arith.constant 0 : index
    %156 = vector.load %arg5[%155, %c0_53] : memref<16x32xf32, #tpu.memory_space<vmem>>, vector<1x32xf32>
    tpu.vector_store %arg5[%155, %c0_53], %153 {strides = array<i32>} : memref<16x32xf32, #tpu.memory_space<vmem>>, vector<1x32xf32>,
    %157 = vector.extract_strided_slice %152 {offsets = [1, 0], sizes = [1, 32], strides = [1, 1]} : vector<2x32xf32> to vector<1x32xf32>
    %c8_i32_54 = arith.constant 8 : i32
    %158 = arith.addi %c8_i32_54, %c4_i32 : i32
    %159 = arith.index_cast %158 : i32 to index
    %c0_55 = arith.constant 0 : index
    %160 = vector.load %arg5[%159, %c0_55] : memref<16x32xf32, #tpu.memory_space<vmem>>, vector<1x32xf32>
    tpu.vector_store %arg5[%159, %c0_55], %157 {strides = array<i32>} : memref<16x32xf32, #tpu.memory_space<vmem>>, vector<1x32xf32>,
    %c5_i32 = arith.constant 5 : i32
    %c2_i32_56 = arith.constant 2 : i32
    %161 = arith.muli %c5_i32, %c2_i32_56 : i32
    %162 = arith.index_cast %161 : i32 to index
    %c0_57 = arith.constant 0 : index
    %163 = vector.load %arg4[%162, %c0_57] : memref<16x128xf32, #tpu.memory_space<vmem>>, vector<2x128xf32>
    %cst_58 = arith.constant dense<0.000000e+00> : vector<2x128xf32>
    %164 = tpu.matmul %152, %2, %cst_58 {dimension_numbers = #tpu.dot_dimension_numbers<[1], [0], [0], [1], [0, 0, 1, 1], [], []>} : vector<2x32xf32>, vector<32x128xf32>, vector<2x128xf32> -> vector<2x128xf32>
    %165 = arith.addf %163, %164 : vector<2x128xf32>
    %cst_59 = arith.constant 5.000000e-01 : f32
    %166 = vector.broadcast %cst_59 : f32 to vector<2x128xf32>
    %167 = arith.mulf %166, %165 : vector<2x128xf32>
    %168 = math.tanh %167 : vector<2x128xf32>
    %cst_60 = arith.constant 1.000000e+00 : f32
    %169 = vector.broadcast %cst_60 : f32 to vector<2x128xf32>
    %170 = arith.addf %168, %169 : vector<2x128xf32>
    %cst_61 = arith.constant 5.000000e-01 : f32
    %171 = vector.broadcast %cst_61 : f32 to vector<2x128xf32>
    %172 = arith.mulf %171, %170 : vector<2x128xf32>
    %173 = math.tanh %165 : vector<2x128xf32>
    %174 = vector.extract_strided_slice %172 {offsets = [0, 32], sizes = [2, 32], strides = [1, 1]} : vector<2x128xf32> to vector<2x32xf32>
    %175 = arith.mulf %174, %149 : vector<2x32xf32>
    %176 = vector.extract_strided_slice %172 {offsets = [0, 0], sizes = [2, 32], strides = [1, 1]} : vector<2x128xf32> to vector<2x32xf32>
    %177 = vector.extract_strided_slice %173 {offsets = [0, 64], sizes = [2, 32], strides = [1, 1]} : vector<2x128xf32> to vector<2x32xf32>
    %178 = arith.mulf %176, %177 : vector<2x32xf32>
    %179 = arith.addf %175, %178 : vector<2x32xf32>
    %180 = vector.extract_strided_slice %172 {offsets = [0, 96], sizes = [2, 32], strides = [1, 1]} : vector<2x128xf32> to vector<2x32xf32>
    %181 = math.tanh %179 : vector<2x32xf32>
    %182 = arith.mulf %180, %181 : vector<2x32xf32>
    %183 = vector.extract_strided_slice %182 {offsets = [0, 0], sizes = [1, 32], strides = [1, 1]} : vector<2x32xf32> to vector<1x32xf32>
    %c0_i32_62 = arith.constant 0 : i32
    %184 = arith.addi %c0_i32_62, %c5_i32 : i32
    %185 = arith.index_cast %184 : i32 to index
    %c0_63 = arith.constant 0 : index
    %186 = vector.load %arg5[%185, %c0_63] : memref<16x32xf32, #tpu.memory_space<vmem>>, vector<1x32xf32>
    tpu.vector_store %arg5[%185, %c0_63], %183 {strides = array<i32>} : memref<16x32xf32, #tpu.memory_space<vmem>>, vector<1x32xf32>,
    %187 = vector.extract_strided_slice %182 {offsets = [1, 0], sizes = [1, 32], strides = [1, 1]} : vector<2x32xf32> to vector<1x32xf32>
    %c8_i32_64 = arith.constant 8 : i32
    %188 = arith.addi %c8_i32_64, %c5_i32 : i32
    %189 = arith.index_cast %188 : i32 to index
    %c0_65 = arith.constant 0 : index
    %190 = vector.load %arg5[%189, %c0_65] : memref<16x32xf32, #tpu.memory_space<vmem>>, vector<1x32xf32>
    tpu.vector_store %arg5[%189, %c0_65], %187 {strides = array<i32>} : memref<16x32xf32, #tpu.memory_space<vmem>>, vector<1x32xf32>,
    %c6_i32 = arith.constant 6 : i32
    %c2_i32_66 = arith.constant 2 : i32
    %191 = arith.muli %c6_i32, %c2_i32_66 : i32
    %192 = arith.index_cast %191 : i32 to index
    %c0_67 = arith.constant 0 : index
    %193 = vector.load %arg4[%192, %c0_67] : memref<16x128xf32, #tpu.memory_space<vmem>>, vector<2x128xf32>
    %cst_68 = arith.constant dense<0.000000e+00> : vector<2x128xf32>
    %194 = tpu.matmul %182, %2, %cst_68 {dimension_numbers = #tpu.dot_dimension_numbers<[1], [0], [0], [1], [0, 0, 1, 1], [], []>} : vector<2x32xf32>, vector<32x128xf32>, vector<2x128xf32> -> vector<2x128xf32>
    %195 = arith.addf %193, %194 : vector<2x128xf32>
    %cst_69 = arith.constant 5.000000e-01 : f32
    %196 = vector.broadcast %cst_69 : f32 to vector<2x128xf32>
    %197 = arith.mulf %196, %195 : vector<2x128xf32>
    %198 = math.tanh %197 : vector<2x128xf32>
    %cst_70 = arith.constant 1.000000e+00 : f32
    %199 = vector.broadcast %cst_70 : f32 to vector<2x128xf32>
    %200 = arith.addf %198, %199 : vector<2x128xf32>
    %cst_71 = arith.constant 5.000000e-01 : f32
    %201 = vector.broadcast %cst_71 : f32 to vector<2x128xf32>
    %202 = arith.mulf %201, %200 : vector<2x128xf32>
    %203 = math.tanh %195 : vector<2x128xf32>
    %204 = vector.extract_strided_slice %202 {offsets = [0, 32], sizes = [2, 32], strides = [1, 1]} : vector<2x128xf32> to vector<2x32xf32>
    %205 = arith.mulf %204, %179 : vector<2x32xf32>
    %206 = vector.extract_strided_slice %202 {offsets = [0, 0], sizes = [2, 32], strides = [1, 1]} : vector<2x128xf32> to vector<2x32xf32>
    %207 = vector.extract_strided_slice %203 {offsets = [0, 64], sizes = [2, 32], strides = [1, 1]} : vector<2x128xf32> to vector<2x32xf32>
    %208 = arith.mulf %206, %207 : vector<2x32xf32>
    %209 = arith.addf %205, %208 : vector<2x32xf32>
    %210 = vector.extract_strided_slice %202 {offsets = [0, 96], sizes = [2, 32], strides = [1, 1]} : vector<2x128xf32> to vector<2x32xf32>
    %211 = math.tanh %209 : vector<2x32xf32>
    %212 = arith.mulf %210, %211 : vector<2x32xf32>
    %213 = vector.extract_strided_slice %212 {offsets = [0, 0], sizes = [1, 32], strides = [1, 1]} : vector<2x32xf32> to vector<1x32xf32>
    %c0_i32_72 = arith.constant 0 : i32
    %214 = arith.addi %c0_i32_72, %c6_i32 : i32
    %215 = arith.index_cast %214 : i32 to index
    %c0_73 = arith.constant 0 : index
    %216 = vector.load %arg5[%215, %c0_73] : memref<16x32xf32, #tpu.memory_space<vmem>>, vector<1x32xf32>
    tpu.vector_store %arg5[%215, %c0_73], %213 {strides = array<i32>} : memref<16x32xf32, #tpu.memory_space<vmem>>, vector<1x32xf32>,
    %217 = vector.extract_strided_slice %212 {offsets = [1, 0], sizes = [1, 32], strides = [1, 1]} : vector<2x32xf32> to vector<1x32xf32>
    %c8_i32_74 = arith.constant 8 : i32
    %218 = arith.addi %c8_i32_74, %c6_i32 : i32
    %219 = arith.index_cast %218 : i32 to index
    %c0_75 = arith.constant 0 : index
    %220 = vector.load %arg5[%219, %c0_75] : memref<16x32xf32, #tpu.memory_space<vmem>>, vector<1x32xf32>
    tpu.vector_store %arg5[%219, %c0_75], %217 {strides = array<i32>} : memref<16x32xf32, #tpu.memory_space<vmem>>, vector<1x32xf32>,
    %c7_i32 = arith.constant 7 : i32
    %c2_i32_76 = arith.constant 2 : i32
    %221 = arith.muli %c7_i32, %c2_i32_76 : i32
    %222 = arith.index_cast %221 : i32 to index
    %c0_77 = arith.constant 0 : index
    %223 = vector.load %arg4[%222, %c0_77] : memref<16x128xf32, #tpu.memory_space<vmem>>, vector<2x128xf32>
    %cst_78 = arith.constant dense<0.000000e+00> : vector<2x128xf32>
    %224 = tpu.matmul %212, %2, %cst_78 {dimension_numbers = #tpu.dot_dimension_numbers<[1], [0], [0], [1], [0, 0, 1, 1], [], []>} : vector<2x32xf32>, vector<32x128xf32>, vector<2x128xf32> -> vector<2x128xf32>
    %225 = arith.addf %223, %224 : vector<2x128xf32>
    %cst_79 = arith.constant 5.000000e-01 : f32
    %226 = vector.broadcast %cst_79 : f32 to vector<2x128xf32>
    %227 = arith.mulf %226, %225 : vector<2x128xf32>
    %228 = math.tanh %227 : vector<2x128xf32>
    %cst_80 = arith.constant 1.000000e+00 : f32
    %229 = vector.broadcast %cst_80 : f32 to vector<2x128xf32>
    %230 = arith.addf %228, %229 : vector<2x128xf32>
    %cst_81 = arith.constant 5.000000e-01 : f32
    %231 = vector.broadcast %cst_81 : f32 to vector<2x128xf32>
    %232 = arith.mulf %231, %230 : vector<2x128xf32>
    %233 = math.tanh %225 : vector<2x128xf32>
    %234 = vector.extract_strided_slice %232 {offsets = [0, 32], sizes = [2, 32], strides = [1, 1]} : vector<2x128xf32> to vector<2x32xf32>
    %235 = arith.mulf %234, %209 : vector<2x32xf32>
    %236 = vector.extract_strided_slice %232 {offsets = [0, 0], sizes = [2, 32], strides = [1, 1]} : vector<2x128xf32> to vector<2x32xf32>
    %237 = vector.extract_strided_slice %233 {offsets = [0, 64], sizes = [2, 32], strides = [1, 1]} : vector<2x128xf32> to vector<2x32xf32>
    %238 = arith.mulf %236, %237 : vector<2x32xf32>
    %239 = arith.addf %235, %238 : vector<2x32xf32>
    %240 = vector.extract_strided_slice %232 {offsets = [0, 96], sizes = [2, 32], strides = [1, 1]} : vector<2x128xf32> to vector<2x32xf32>
    %241 = math.tanh %239 : vector<2x32xf32>
    %242 = arith.mulf %240, %241 : vector<2x32xf32>
    %243 = vector.extract_strided_slice %242 {offsets = [0, 0], sizes = [1, 32], strides = [1, 1]} : vector<2x32xf32> to vector<1x32xf32>
    %c0_i32_82 = arith.constant 0 : i32
    %244 = arith.addi %c0_i32_82, %c7_i32 : i32
    %245 = arith.index_cast %244 : i32 to index
    %c0_83 = arith.constant 0 : index
    %246 = vector.load %arg5[%245, %c0_83] : memref<16x32xf32, #tpu.memory_space<vmem>>, vector<1x32xf32>
    tpu.vector_store %arg5[%245, %c0_83], %243 {strides = array<i32>} : memref<16x32xf32, #tpu.memory_space<vmem>>, vector<1x32xf32>,
    %247 = vector.extract_strided_slice %242 {offsets = [1, 0], sizes = [1, 32], strides = [1, 1]} : vector<2x32xf32> to vector<1x32xf32>
    %c8_i32_84 = arith.constant 8 : i32
    %248 = arith.addi %c8_i32_84, %c7_i32 : i32
    %249 = arith.index_cast %248 : i32 to index
    %c0_85 = arith.constant 0 : index
    %250 = vector.load %arg5[%249, %c0_85] : memref<16x32xf32, #tpu.memory_space<vmem>>, vector<1x32xf32>
    tpu.vector_store %arg5[%249, %c0_85], %247 {strides = array<i32>} : memref<16x32xf32, #tpu.memory_space<vmem>>, vector<1x32xf32>,
    %c8_i32_86 = arith.constant 8 : i32
    %c0_87 = arith.constant 0 : index
    %c0_88 = arith.constant 0 : index
    %251 = vector.load %arg5[%c0_87, %c0_88] : memref<16x32xf32, #tpu.memory_space<vmem>>, vector<16x32xf32>
    %c0_89 = arith.constant 0 : index
    %c0_90 = arith.constant 0 : index
    %252 = vector.load %arg1[%c0_89, %c0_90] : memref<2x32xf32, #tpu.memory_space<vmem>>, vector<2x32xf32>
    %c232 = arith.constant 232 : index
    %c0_91 = arith.constant 0 : index
    %253 = vector.load %arg2[%c232, %c0_91] : memref<912x128xf32, #tpu.memory_space<vmem>>, vector<32x64xf32>
    %cst_92 = arith.constant dense<0.000000e+00> : vector<2x64xf32>
    %254 = tpu.matmul %252, %253, %cst_92 {dimension_numbers = #tpu.dot_dimension_numbers<[1], [0], [0], [1], [0, 0, 1, 1], [], []>} : vector<2x32xf32>, vector<32x64xf32>, vector<2x64xf32> -> vector<2x64xf32>
    %c264 = arith.constant 264 : index
    %c0_93 = arith.constant 0 : index
    %255 = vector.load %arg2[%c264, %c0_93] : memref<912x128xf32, #tpu.memory_space<vmem>>, vector<1x64xf32>
    %256 = vector.broadcast %255 : vector<1x64xf32> to vector<2x64xf32>
    %257 = arith.addf %254, %256 : vector<2x64xf32>
    %cst_94 = arith.constant 0.000000e+00 : f32
    %258 = vector.broadcast %cst_94 : f32 to vector<2x64xf32>
    %259 = arith.maximumf %257, %258 : vector<2x64xf32>
    %c272 = arith.constant 272 : index
    %c0_95 = arith.constant 0 : index
    %260 = vector.load %arg2[%c272, %c0_95] : memref<912x128xf32, #tpu.memory_space<vmem>>, vector<64x64xf32>
    %cst_96 = arith.constant dense<0.000000e+00> : vector<2x64xf32>
    %261 = tpu.matmul %259, %260, %cst_96 {dimension_numbers = #tpu.dot_dimension_numbers<[1], [0], [0], [1], [0, 0, 1, 1], [], []>} : vector<2x64xf32>, vector<64x64xf32>, vector<2x64xf32> -> vector<2x64xf32>
    %c336 = arith.constant 336 : index
    %c0_97 = arith.constant 0 : index
    %262 = vector.load %arg2[%c336, %c0_97] : memref<912x128xf32, #tpu.memory_space<vmem>>, vector<1x64xf32>
    %263 = vector.broadcast %262 : vector<1x64xf32> to vector<2x64xf32>
    %264 = arith.addf %261, %263 : vector<2x64xf32>
    %cst_98 = arith.constant 0.000000e+00 : f32
    %265 = vector.broadcast %cst_98 : f32 to vector<2x64xf32>
    %266 = arith.maximumf %264, %265 : vector<2x64xf32>
    %c344 = arith.constant 344 : index
    %c0_99 = arith.constant 0 : index
    %267 = vector.load %arg2[%c344, %c0_99] : memref<912x128xf32, #tpu.memory_space<vmem>>, vector<64x32xf32>
    %cst_100 = arith.constant dense<0.000000e+00> : vector<2x32xf32>
    %268 = tpu.matmul %266, %267, %cst_100 {dimension_numbers = #tpu.dot_dimension_numbers<[1], [0], [0], [1], [0, 0, 1, 1], [], []>} : vector<2x64xf32>, vector<64x32xf32>, vector<2x32xf32> -> vector<2x32xf32>
    %c408 = arith.constant 408 : index
    %c0_101 = arith.constant 0 : index
    %269 = vector.load %arg2[%c408, %c0_101] : memref<912x128xf32, #tpu.memory_space<vmem>>, vector<1x32xf32>
    %270 = vector.broadcast %269 : vector<1x32xf32> to vector<2x32xf32>
    %271 = arith.addf %268, %270 : vector<2x32xf32>
    %c48 = arith.constant 48 : index
    %c0_102 = arith.constant 0 : index
    %272 = vector.load %arg2[%c48, %c0_102] : memref<912x128xf32, #tpu.memory_space<vmem>>, vector<32x64xf32>
    %cst_103 = arith.constant dense<0.000000e+00> : vector<16x64xf32>
    %273 = tpu.matmul %251, %272, %cst_103 {dimension_numbers = #tpu.dot_dimension_numbers<[1], [0], [0], [1], [0, 0, 1, 1], [], []>} : vector<16x32xf32>, vector<32x64xf32>, vector<16x64xf32> -> vector<16x64xf32>
    %c80 = arith.constant 80 : index
    %c0_104 = arith.constant 0 : index
    %274 = vector.load %arg2[%c80, %c0_104] : memref<912x128xf32, #tpu.memory_space<vmem>>, vector<1x64xf32>
    %275 = vector.broadcast %274 : vector<1x64xf32> to vector<16x64xf32>
    %276 = arith.addf %273, %275 : vector<16x64xf32>
    %cst_105 = arith.constant 0.000000e+00 : f32
    %277 = vector.broadcast %cst_105 : f32 to vector<16x64xf32>
    %278 = arith.maximumf %276, %277 : vector<16x64xf32>
    %c88 = arith.constant 88 : index
    %c0_106 = arith.constant 0 : index
    %279 = vector.load %arg2[%c88, %c0_106] : memref<912x128xf32, #tpu.memory_space<vmem>>, vector<64x64xf32>
    %cst_107 = arith.constant dense<0.000000e+00> : vector<16x64xf32>
    %280 = tpu.matmul %278, %279, %cst_107 {dimension_numbers = #tpu.dot_dimension_numbers<[1], [0], [0], [1], [0, 0, 1, 1], [], []>} : vector<16x64xf32>, vector<64x64xf32>, vector<16x64xf32> -> vector<16x64xf32>
    %c152 = arith.constant 152 : index
    %c0_108 = arith.constant 0 : index
    %281 = vector.load %arg2[%c152, %c0_108] : memref<912x128xf32, #tpu.memory_space<vmem>>, vector<1x64xf32>
    %282 = vector.broadcast %281 : vector<1x64xf32> to vector<16x64xf32>
    %283 = arith.addf %280, %282 : vector<16x64xf32>
    %cst_109 = arith.constant 0.000000e+00 : f32
    %284 = vector.broadcast %cst_109 : f32 to vector<16x64xf32>
    %285 = arith.maximumf %283, %284 : vector<16x64xf32>
    %c160 = arith.constant 160 : index
    %c0_110 = arith.constant 0 : index
    %286 = vector.load %arg2[%c160, %c0_110] : memref<912x128xf32, #tpu.memory_space<vmem>>, vector<64x32xf32>
    %cst_111 = arith.constant dense<0.000000e+00> : vector<16x32xf32>
    %287 = tpu.matmul %285, %286, %cst_111 {dimension_numbers = #tpu.dot_dimension_numbers<[1], [0], [0], [1], [0, 0, 1, 1], [], []>} : vector<16x64xf32>, vector<64x32xf32>, vector<16x32xf32> -> vector<16x32xf32>
    %c224 = arith.constant 224 : index
    %c0_112 = arith.constant 0 : index
    %288 = vector.load %arg2[%c224, %c0_112] : memref<912x128xf32, #tpu.memory_space<vmem>>, vector<1x32xf32>
    %289 = vector.broadcast %288 : vector<1x32xf32> to vector<16x32xf32>
    %290 = arith.addf %287, %289 : vector<16x32xf32>
    %291 = vector.shape_cast %290 : vector<16x32xf32> to vector<2x8x32xf32>
    %292 = vector.shape_cast %271 : vector<2x32xf32> to vector<2x1x32xf32>
    %293 = vector.broadcast %292 : vector<2x1x32xf32> to vector<2x8x32xf32>
    %294 = arith.mulf %291, %293 : vector<2x8x32xf32>
    %cst_113 = arith.constant dense<0xFF800000> : vector<2x32xf32>
    %295 = vector.multi_reduction <maximumf>, %294, %cst_113 [1] : vector<2x8x32xf32> to vector<2x32xf32>
    %296 = vector.shape_cast %294 : vector<2x8x32xf32> to vector<16x32xf32>
    %cst_114 = arith.constant 1.000000e+00 : f32
    %297 = vector.broadcast %cst_114 : f32 to vector<16x32xf32>
    %298 = arith.mulf %251, %297 : vector<16x32xf32>
    %299 = arith.addf %298, %296 : vector<16x32xf32>
    %cst_115 = arith.constant 5.000000e-01 : f32
    %300 = vector.broadcast %cst_115 : f32 to vector<16x32xf32>
    %301 = arith.mulf %299, %300 : vector<16x32xf32>
    %cst_116 = arith.constant 1.000000e+00 : f32
    %302 = vector.broadcast %cst_116 : f32 to vector<2x32xf32>
    %303 = arith.mulf %252, %302 : vector<2x32xf32>
    %304 = arith.addf %303, %295 : vector<2x32xf32>
    %cst_117 = arith.constant 5.000000e-01 : f32
    %305 = vector.broadcast %cst_117 : f32 to vector<2x32xf32>
    %306 = arith.mulf %304, %305 : vector<2x32xf32>
    %c600 = arith.constant 600 : index
    %c0_118 = arith.constant 0 : index
    %307 = vector.load %arg2[%c600, %c0_118] : memref<912x128xf32, #tpu.memory_space<vmem>>, vector<32x64xf32>
    %cst_119 = arith.constant dense<0.000000e+00> : vector<2x64xf32>
    %308 = tpu.matmul %306, %307, %cst_119 {dimension_numbers = #tpu.dot_dimension_numbers<[1], [0], [0], [1], [0, 0, 1, 1], [], []>} : vector<2x32xf32>, vector<32x64xf32>, vector<2x64xf32> -> vector<2x64xf32>
    %c632 = arith.constant 632 : index
    %c0_120 = arith.constant 0 : index
    %309 = vector.load %arg2[%c632, %c0_120] : memref<912x128xf32, #tpu.memory_space<vmem>>, vector<1x64xf32>
    %310 = vector.broadcast %309 : vector<1x64xf32> to vector<2x64xf32>
    %311 = arith.addf %308, %310 : vector<2x64xf32>
    %cst_121 = arith.constant 0.000000e+00 : f32
    %312 = vector.broadcast %cst_121 : f32 to vector<2x64xf32>
    %313 = arith.maximumf %311, %312 : vector<2x64xf32>
    %c640 = arith.constant 640 : index
    %c0_122 = arith.constant 0 : index
    %314 = vector.load %arg2[%c640, %c0_122] : memref<912x128xf32, #tpu.memory_space<vmem>>, vector<64x64xf32>
    %cst_123 = arith.constant dense<0.000000e+00> : vector<2x64xf32>
    %315 = tpu.matmul %313, %314, %cst_123 {dimension_numbers = #tpu.dot_dimension_numbers<[1], [0], [0], [1], [0, 0, 1, 1], [], []>} : vector<2x64xf32>, vector<64x64xf32>, vector<2x64xf32> -> vector<2x64xf32>
    %c704 = arith.constant 704 : index
    %c0_124 = arith.constant 0 : index
    %316 = vector.load %arg2[%c704, %c0_124] : memref<912x128xf32, #tpu.memory_space<vmem>>, vector<1x64xf32>
    %317 = vector.broadcast %316 : vector<1x64xf32> to vector<2x64xf32>
    %318 = arith.addf %315, %317 : vector<2x64xf32>
    %cst_125 = arith.constant 0.000000e+00 : f32
    %319 = vector.broadcast %cst_125 : f32 to vector<2x64xf32>
    %320 = arith.maximumf %318, %319 : vector<2x64xf32>
    %c712 = arith.constant 712 : index
    %c0_126 = arith.constant 0 : index
    %321 = vector.load %arg2[%c712, %c0_126] : memref<912x128xf32, #tpu.memory_space<vmem>>, vector<64x32xf32>
    %cst_127 = arith.constant dense<0.000000e+00> : vector<2x32xf32>
    %322 = tpu.matmul %320, %321, %cst_127 {dimension_numbers = #tpu.dot_dimension_numbers<[1], [0], [0], [1], [0, 0, 1, 1], [], []>} : vector<2x64xf32>, vector<64x32xf32>, vector<2x32xf32> -> vector<2x32xf32>
    %c776 = arith.constant 776 : index
    %c0_128 = arith.constant 0 : index
    %323 = vector.load %arg2[%c776, %c0_128] : memref<912x128xf32, #tpu.memory_space<vmem>>, vector<1x32xf32>
    %324 = vector.broadcast %323 : vector<1x32xf32> to vector<2x32xf32>
    %325 = arith.addf %322, %324 : vector<2x32xf32>
    %c416 = arith.constant 416 : index
    %c0_129 = arith.constant 0 : index
    %326 = vector.load %arg2[%c416, %c0_129] : memref<912x128xf32, #tpu.memory_space<vmem>>, vector<32x64xf32>
    %cst_130 = arith.constant dense<0.000000e+00> : vector<16x64xf32>
    %327 = tpu.matmul %301, %326, %cst_130 {dimension_numbers = #tpu.dot_dimension_numbers<[1], [0], [0], [1], [0, 0, 1, 1], [], []>} : vector<16x32xf32>, vector<32x64xf32>, vector<16x64xf32> -> vector<16x64xf32>
    %c448 = arith.constant 448 : index
    %c0_131 = arith.constant 0 : index
    %328 = vector.load %arg2[%c448, %c0_131] : memref<912x128xf32, #tpu.memory_space<vmem>>, vector<1x64xf32>
    %329 = vector.broadcast %328 : vector<1x64xf32> to vector<16x64xf32>
    %330 = arith.addf %327, %329 : vector<16x64xf32>
    %cst_132 = arith.constant 0.000000e+00 : f32
    %331 = vector.broadcast %cst_132 : f32 to vector<16x64xf32>
    %332 = arith.maximumf %330, %331 : vector<16x64xf32>
    %c456 = arith.constant 456 : index
    %c0_133 = arith.constant 0 : index
    %333 = vector.load %arg2[%c456, %c0_133] : memref<912x128xf32, #tpu.memory_space<vmem>>, vector<64x64xf32>
    %cst_134 = arith.constant dense<0.000000e+00> : vector<16x64xf32>
    %334 = tpu.matmul %332, %333, %cst_134 {dimension_numbers = #tpu.dot_dimension_numbers<[1], [0], [0], [1], [0, 0, 1, 1], [], []>} : vector<16x64xf32>, vector<64x64xf32>, vector<16x64xf32> -> vector<16x64xf32>
    %c520 = arith.constant 520 : index
    %c0_135 = arith.constant 0 : index
    %335 = vector.load %arg2[%c520, %c0_135] : memref<912x128xf32, #tpu.memory_space<vmem>>, vector<1x64xf32>
    %336 = vector.broadcast %335 : vector<1x64xf32> to vector<16x64xf32>
    %337 = arith.addf %334, %336 : vector<16x64xf32>
    %cst_136 = arith.constant 0.000000e+00 : f32
    %338 = vector.broadcast %cst_136 : f32 to vector<16x64xf32>
    %339 = arith.maximumf %337, %338 : vector<16x64xf32>
    %c528 = arith.constant 528 : index
    %c0_137 = arith.constant 0 : index
    %340 = vector.load %arg2[%c528, %c0_137] : memref<912x128xf32, #tpu.memory_space<vmem>>, vector<64x32xf32>
    %cst_138 = arith.constant dense<0.000000e+00> : vector<16x32xf32>
    %341 = tpu.matmul %339, %340, %cst_138 {dimension_numbers = #tpu.dot_dimension_numbers<[1], [0], [0], [1], [0, 0, 1, 1], [], []>} : vector<16x64xf32>, vector<64x32xf32>, vector<16x32xf32> -> vector<16x32xf32>
    %c592 = arith.constant 592 : index
    %c0_139 = arith.constant 0 : index
    %342 = vector.load %arg2[%c592, %c0_139] : memref<912x128xf32, #tpu.memory_space<vmem>>, vector<1x32xf32>
    %343 = vector.broadcast %342 : vector<1x32xf32> to vector<16x32xf32>
    %344 = arith.addf %341, %343 : vector<16x32xf32>
    %345 = vector.shape_cast %344 : vector<16x32xf32> to vector<2x8x32xf32>
    %346 = vector.shape_cast %325 : vector<2x32xf32> to vector<2x1x32xf32>
    %347 = vector.broadcast %346 : vector<2x1x32xf32> to vector<2x8x32xf32>
    %348 = arith.mulf %345, %347 : vector<2x8x32xf32>
    %349 = vector.shape_cast %348 : vector<2x8x32xf32> to vector<16x32xf32>
    %cst_140 = arith.constant 2.000000e+00 : f32
    %350 = vector.broadcast %cst_140 : f32 to vector<16x32xf32>
    %351 = arith.mulf %301, %350 : vector<16x32xf32>
    %352 = arith.addf %351, %349 : vector<16x32xf32>
    %cst_141 = arith.constant 0.333333343 : f32
    %353 = vector.broadcast %cst_141 : f32 to vector<16x32xf32>
    %354 = arith.mulf %352, %353 : vector<16x32xf32>
    %c784 = arith.constant 784 : index
    %c0_142 = arith.constant 0 : index
    %355 = vector.load %arg2[%c784, %c0_142] : memref<912x128xf32, #tpu.memory_space<vmem>>, vector<32x64xf32>
    %cst_143 = arith.constant dense<0.000000e+00> : vector<16x64xf32>
    %356 = tpu.matmul %354, %355, %cst_143 {dimension_numbers = #tpu.dot_dimension_numbers<[1], [0], [0], [1], [0, 0, 1, 1], [], []>} : vector<16x32xf32>, vector<32x64xf32>, vector<16x64xf32> -> vector<16x64xf32>
    %c816 = arith.constant 816 : index
    %c0_144 = arith.constant 0 : index
    %357 = vector.load %arg2[%c816, %c0_144] : memref<912x128xf32, #tpu.memory_space<vmem>>, vector<1x64xf32>
    %358 = vector.broadcast %357 : vector<1x64xf32> to vector<16x64xf32>
    %359 = arith.addf %356, %358 : vector<16x64xf32>
    %cst_145 = arith.constant 0.000000e+00 : f32
    %360 = vector.broadcast %cst_145 : f32 to vector<16x64xf32>
    %361 = arith.maximumf %359, %360 : vector<16x64xf32>
    %c824 = arith.constant 824 : index
    %c0_146 = arith.constant 0 : index
    %362 = vector.load %arg2[%c824, %c0_146] : memref<912x128xf32, #tpu.memory_space<vmem>>, vector<64x32xf32>
    %cst_147 = arith.constant dense<0.000000e+00> : vector<16x32xf32>
    %363 = tpu.matmul %361, %362, %cst_147 {dimension_numbers = #tpu.dot_dimension_numbers<[1], [0], [0], [1], [0, 0, 1, 1], [], []>} : vector<16x64xf32>, vector<64x32xf32>, vector<16x32xf32> -> vector<16x32xf32>
    %c888 = arith.constant 888 : index
    %c0_148 = arith.constant 0 : index
    %364 = vector.load %arg2[%c888, %c0_148] : memref<912x128xf32, #tpu.memory_space<vmem>>, vector<1x32xf32>
    %365 = vector.broadcast %364 : vector<1x32xf32> to vector<16x32xf32>
    %366 = arith.addf %363, %365 : vector<16x32xf32>
    %cst_149 = arith.constant 0.000000e+00 : f32
    %367 = vector.broadcast %cst_149 : f32 to vector<16x32xf32>
    %368 = arith.maximumf %366, %367 : vector<16x32xf32>
    %c896 = arith.constant 896 : index
    %c0_150 = arith.constant 0 : index
    %369 = vector.load %arg2[%c896, %c0_150] : memref<912x128xf32, #tpu.memory_space<vmem>>, vector<1x32xf32>
    %370 = vector.broadcast %369 : vector<1x32xf32> to vector<16x32xf32>
    %371 = arith.mulf %368, %370 : vector<16x32xf32>
    %cst_151 = arith.constant dense<0.000000e+00> : vector<16xf32>
    %372 = vector.multi_reduction <add>, %371, %cst_151 [1] : vector<16x32xf32> to vector<16xf32>
    %373 = vector.shape_cast %372 : vector<16xf32> to vector<16x1xf32>
    %c904 = arith.constant 904 : index
    %c0_152 = arith.constant 0 : index
    %374 = vector.load %arg2[%c904, %c0_152] : memref<912x128xf32, #tpu.memory_space<vmem>>, vector<1x1xf32>
    %375 = vector.broadcast %374 : vector<1x1xf32> to vector<16x1xf32>
    %376 = arith.addf %373, %375 : vector<16x1xf32>
    %c0_153 = arith.constant 0 : index
    %c0_154 = arith.constant 0 : index
    %377 = vector.load %arg3[%c0_153, %c0_154] : memref<16x1xf32, #tpu.memory_space<vmem>>, vector<16x1xf32>
    tpu.vector_store %arg3[%c0_153, %c0_154], %376 {strides = array<i32>} : memref<16x1xf32, #tpu.memory_space<vmem>>, vector<16x1xf32>,
    return
  }
}

</mosaic_0001>

<bundles_post_ra>
// kernel: forward.1
= control target key start
LH: loop header
LB: loop body
LE: loop exit
PB: predicated region body
PF: predicated region fallthrough
CT: control target
= control target key end

     0   :  { %8 = vsyncpa [#allocation5], 0  ;;  %s1185_s15 = smov [#allocation4]   ;;  %s1186_s17 = smov 128   ;;  %s1339_s0 = inlined_call_operand.vmem [shape: f32[16,1], index: 0, kind: input, shape index: {}]   ;;  %s1340_s1 = inlined_call_operand.vmem [shape: f32[2,32], index: 1, kind: input, shape index: {}]   ;;  %s1341_s2 = inlined_call_operand.hbm [shape: f32[912,128], index: 2, kind: input, shape index: {}]   ;;  %s1342_s3 = inlined_call_operand.vmem [shape: f32[16,1], index: 3, kind: output, shape index: {}]  }
   0x1   :  { %s17_s14 = sshll.u32 %s1341_s2, 4  ;;  %s19_s16 = sshll.u32 %s1185_s15, 4  ;;  %s18_s14 = int_to_ptr.hbm [resolvable:$true] %s17_s14  ;;  %s20_s16 = int_to_ptr.vmem [resolvable:$true] %s19_s16 }
   0x2   :  { %s1187_s18 = smov 8  }
   0x3   :  { %25 = dma.hbm_to_vmem [thread:$0]  %s18_s14, 14592, %s20_s16, [#allocation5], %s1186_s17, %s1186_s17, %s1187_s18  }
   0x4   :  { %1183 = dma.done.wait [#allocation5], 14592  }
   0x5   :  { %1184 = vsyncadd [#allocation5], 4294952704  ;;  %v1188_v0 = vmov 0   ;;  %v35_v1 = vld [vmem:[#allocation4 + $0x18] sm:$0xff]  ;;  %v34_v2 = vld [vmem:[#allocation4 + $0x10] sm:$0xff]  ;;  %v1189_v6 = vmov 0.0  }
   0x6   :  { %1091 = vset.pattern.permute.xlu0 %v1188_v0  ;;  %1092 = vset.pattern.permute.xlu2 %v1188_v0  ;;  %v33_v3 = vld [vmem:[#allocation4 + $0x8] sm:$0xff]  ;;  %v36_v4 = vld [vmem:[%s1339_s0] sm:$0xff]  ;;  %s1190_s2 = smov 64   ;;  %s1191_s21 = smov 32   ;;  %vm108_vm0 = vcmask 253952   ;;  %vm57_vm1 = vcmask 261120  }
   0x7   :  { %73 = vmatpush.msra.mxu2 %v35_v1  ;;  %127 = vmatpush.msra.mxu1 %v35_v1  ;;  %v32_v5 = vld [vmem:[#allocation4] sm:$0xff]  ;;  %v1220_v8 = vld [vmem:[#allocation4 + $0x28] ss:$0 sm:$0xff]  ;;  %vm110_vm2 = vcmask 254977   ;;  %vm519_vm3 = vcmask 523264   ;;  %vm722_vm4 = vcmask 1041409  }
   0x8   :  { %40 = vperm.xlu0 %1091, %v36_v4   ;;  %231 = vmatpush.msra.mxu3 %v35_v1  ;;  %v1218_v7 = vld [vmem:[#allocation4 + $0x20] ss:$0 sm:$0xff]  ;;  %vm1047_vm5 = vcmask 7168  }
   0x9   :  { %74 = vmatpush.msra.mxu2 %v34_v2  ;;  %128 = vmatpush.msra.mxu1 %v34_v2 }
   0xa   :  { %232 = vmatpush.msra.mxu3 %v34_v2  ;;  %283 = vmatpush.msra.mxu0 %v35_v1 }
   0xb   :  { %75 = vmatpush.msra.mxu2 %v33_v3  ;;  %129 = vmatpush.msra.mxu1 %v33_v3 }
   0xc   :  { %233 = vmatpush.msra.mxu3 %v33_v3  ;;  %284 = vmatpush.msra.mxu0 %v34_v2 }
   0xd   :  { %76 = vmatpush.msra.mxu2 %v32_v5  ;;  %130 = vmatpush.msra.mxu1 %v32_v5 }
   0xe   :  { %77 = vmatmul.f32.vlgmr.msra.gmra.mxu2 %v1189_v6  ;;  %234 = vmatpush.msra.mxu3 %v32_v5 }
   0xf   :  { %179 = vmatpush.msrb.mxu2 %v35_v1  ;;  %285 = vmatpush.msra.mxu0 %v33_v3 }
  0x10   :  { %335 = vmatpush.msrb.mxu1 %v35_v1  ;;  %439 = vmatpush.msrb.mxu3 %v35_v1 }
  0x11   :  { %180 = vmatpush.msrb.mxu2 %v34_v2  ;;  %286 = vmatpush.msra.mxu0 %v32_v5 }
  0x12   :  { %336 = vmatpush.msrb.mxu1 %v34_v2  ;;  %440 = vmatpush.msrb.mxu3 %v34_v2 }
  0x13   :  { %181 = vmatpush.msrb.mxu2 %v33_v3 }
  0x14   :  { %337 = vmatpush.msrb.mxu1 %v33_v3  ;;  %441 = vmatpush.msrb.mxu3 %v33_v3 }
  0x15   :  { %182 = vmatpush.msrb.mxu2 %v32_v5 }
  0x16   :  { %338 = vmatpush.msrb.mxu1 %v32_v5  ;;  %442 = vmatpush.msrb.mxu3 %v32_v5 }
  0x17   :  { %387 = vmatpush.msra.mxu2 %v35_v1 }
  0x19   :  { %388 = vmatpush.msra.mxu2 %v34_v2 }
  0x1b   :  { %389 = vmatpush.msra.mxu2 %v33_v3 }
  0x1d   :  { %390 = vmatpush.msra.mxu2 %v32_v5 }
  0x7a   :  { %v41_v9 = vpop.permute.xlu0 %40 }
  0x7b   :  { %v49_v10 = vmul.f32 %v1218_v7, %v41_v9 }
  0x7d   :  { %v52_v11 = vadd.f32 %v1220_v8, %v49_v10 }
  0x7f   :  { %54 = vst [vmem:[#allocation2] sm:$0xff] %v52_v11 }
  0x86   :  { %v56_v12 = vld [vmem:[#allocation2] sm:$0x3]  ;;  %v112_v29 = vld [vmem:[#allocation2 + $0x2] sm:$0x3]  ;;  %v164_v46 = vld [vmem:[#allocation2 + $0x4] sm:$0x3] }
  0x87   :  { %v216_v63 = vld [vmem:[#allocation2 + $0x6] sm:$0x3] }
  0x91   :  { %v78_v13 = vpop.f32.mrf.mxu2 }
  0x92   :  { %v81_v14 = vadd.f32 %v78_v13, %v56_v12 }
  0x94   :  { %1111 = vtanh.f32 %v81_v14  ;;  %v82_v16 = vmul.f32 0.5, %v81_v14 }
  0x96   :  { %1113 = vtanh.f32 %v82_v16 }
  0x9a   :  { %v1112_v15 = vpop.eup %1111 }
  0x9b   :  { %89 = vrot.lane.b32.xlu0 %v1112_v15, %s1190_s2 }
  0x9c   :  { %v1114_v17 = vpop.eup %1113 }
  0x9d   :  { %v84_v18 = vadd.f32 1.0, %v1114_v17  ;;  %v37_v17 = vld [vmem:[%s1339_s0 + $0x8] sm:$0xff] }
  0x9f   :  { %v85_v19 = vmul.f32 0.5, %v84_v18 }
  0xa1   :  { %v87_v22 = vmul.f32 0.0, %v85_v19 }
 0x10d   :  { %v90_v20 = vpop.permute.xlu0 %89 }
 0x10e   :  { %v92_v21 = vmul.f32 %v90_v20, %v85_v19 }
 0x110   :  { %94 = vrot.lane.b32.xlu1 %v92_v21, %s1191_s21 }
 0x182   :  { %v95_v23 = vpop.permute.xlu1 %94 }
 0x183   :  { %v97_v24 = vadd.f32 %v95_v23, %v87_v22 }
 0x185   :  { %1115 = vtanh.f32 %v97_v24 }
 0x18b   :  { %v1116_v25 = vpop.eup %1115 }
 0x18c   :  { %100 = vrot.lane.b32.xlu1 %v1116_v25, %s1190_s2 }
 0x1fe   :  { %v101_v26 = vpop.permute.xlu1 %100 }
 0x1ff   :  { %v103_v27 = vmul.f32 %v101_v26, %v85_v19 }
 0x201   :  { %105 = vrot.lane.b32.xlu2 %v103_v27, %s1191_s21 }
 0x25b   :  { %v106_v28 = vpop.permute.xlu2 %105 }
 0x25c   :  { %109 = vst.msk [vmem:[#allocation3] sm:$0x1] %vm108_vm0, %v106_v28  ;;  %1055 = vmatmul.msk.f32.vlgmr.msra.gmra.mxu1 %vm57_vm1, %v106_v28 }
 0x25d   :  { %111 = vst.msk [vmem:[#allocation3 + $0x7] sm:$0x2] %vm110_vm2, %v106_v28 }
 0x2d9   :  { %v132_v30 = vpop.f32.mrf.mxu1 }
 0x2da   :  { %v135_v31 = vadd.f32 %v132_v30, %v112_v29 }
 0x2dc   :  { %1117 = vtanh.f32 %v135_v31  ;;  %v136_v33 = vmul.f32 0.5, %v135_v31 }
 0x2de   :  { %1119 = vtanh.f32 %v136_v33 }
 0x2e2   :  { %v1118_v32 = vpop.eup %1117 }
 0x2e3   :  { %143 = vrot.lane.b32.xlu2 %v1118_v32, %s1190_s2 }
 0x2e4   :  { %v1120_v34 = vpop.eup %1119 }
 0x2e5   :  { %v138_v35 = vadd.f32 1.0, %v1120_v34 }
 0x2e7   :  { %v139_v36 = vmul.f32 0.5, %v138_v35 }
 0x2e9   :  { %v141_v39 = vmul.f32 %v139_v36, %v97_v24 }
 0x33d   :  { %v144_v37 = vpop.permute.xlu2 %143 }
 0x33e   :  { %v146_v38 = vmul.f32 %v144_v37, %v139_v36 }
 0x340   :  { %148 = vrot.lane.b32.xlu0 %v146_v38, %s1191_s21 }
 0x3b2   :  { %v149_v40 = vpop.permute.xlu0 %148 }
 0x3b3   :  { %v151_v41 = vadd.f32 %v149_v40, %v141_v39 }
 0x3b5   :  { %1121 = vtanh.f32 %v151_v41 }
 0x3bb   :  { %v1122_v42 = vpop.eup %1121 }
 0x3bc   :  { %154 = vrot.lane.b32.xlu1 %v1122_v42, %s1190_s2 }
 0x42e   :  { %v155_v43 = vpop.permute.xlu1 %154 }
 0x42f   :  { %v157_v44 = vmul.f32 %v155_v43, %v139_v36 }
 0x431   :  { %159 = vrot.lane.b32.xlu2 %v157_v44, %s1191_s21 }
 0x48b   :  { %v160_v45 = vpop.permute.xlu2 %159 }
 0x48c   :  { %162 = vst.msk [vmem:[#allocation3 + $0x1] sm:$0x1] %vm108_vm0, %v160_v45  ;;  %1056 = vmatmul.msk.f32.vlgmr.msrb.gmra.mxu2 %vm57_vm1, %v160_v45 }
 0x48d   :  { %163 = vst.msk [vmem:[#allocation3 + $0x8] sm:$0x2] %vm110_vm2, %v160_v45 }
 0x50f   :  { %v184_v47 = vpop.f32.mrf.mxu2 }
 0x510   :  { %v187_v48 = vadd.f32 %v184_v47, %v164_v46 }
 0x512   :  { %1123 = vtanh.f32 %v187_v48  ;;  %v188_v50 = vmul.f32 0.5, %v187_v48 }
 0x514   :  { %1125 = vtanh.f32 %v188_v50 }
 0x518   :  { %v1124_v49 = vpop.eup %1123 }
 0x519   :  { %195 = vrot.lane.b32.xlu0 %v1124_v49, %s1190_s2 }
 0x51a   :  { %v1126_v51 = vpop.eup %1125 }
 0x51b   :  { %v190_v52 = vadd.f32 1.0, %v1126_v51 }
 0x51d   :  { %v191_v53 = vmul.f32 0.5, %v190_v52 }
 0x51f   :  { %v193_v56 = vmul.f32 %v191_v53, %v151_v41 }
 0x58b   :  { %v196_v54 = vpop.permute.xlu0 %195 }
 0x58c   :  { %v198_v55 = vmul.f32 %v196_v54, %v191_v53 }
 0x58e   :  { %200 = vrot.lane.b32.xlu1 %v198_v55, %s1191_s21 }
 0x600   :  { %v201_v57 = vpop.permute.xlu1 %200 }
 0x601   :  { %v203_v58 = vadd.f32 %v201_v57, %v193_v56 }
 0x603   :  { %1127 = vtanh.f32 %v203_v58 }
 0x609   :  { %v1128_v59 = vpop.eup %1127 }
 0x60a   :  { %206 = vrot.lane.b32.xlu2 %v1128_v59, %s1190_s2 }
 0x664   :  { %v207_v60 = vpop.permute.xlu2 %206 }
 0x665   :  { %v209_v61 = vmul.f32 %v207_v60, %v191_v53 }
 0x667   :  { %211 = vrot.lane.b32.xlu0 %v209_v61, %s1191_s21 }
 0x6d9   :  { %v212_v62 = vpop.permute.xlu0 %211 }
 0x6da   :  { %214 = vst.msk [vmem:[#allocation3 + $0x2] sm:$0x1] %vm108_vm0, %v212_v62  ;;  %1057 = vmatmul.msk.f32.vlgmr.msra.gmra.mxu3 %vm57_vm1, %v212_v62 }
 0x6db   :  { %215 = vst.msk [vmem:[#allocation3 + $0x9] sm:$0x2] %vm110_vm2, %v212_v62 }
 0x75d   :  { %v236_v0 = vpop.f32.mrf.mxu3 }
 0x75e   :  { %v239_v1 = vadd.f32 %v236_v0, %v216_v63 }
 0x760   :  { %1129 = vtanh.f32 %v239_v1  ;;  %v240_v3 = vmul.f32 0.5, %v239_v1 }
 0x762   :  { %1131 = vtanh.f32 %v240_v3 }
 0x766   :  { %v1130_v2 = vpop.eup %1129 }
 0x767   :  { %247 = vrot.lane.b32.xlu1 %v1130_v2, %s1190_s2 }
 0x768   :  { %v1132_v4 = vpop.eup %1131 }
 0x769   :  { %v242_v5 = vadd.f32 1.0, %v1132_v4 }
 0x76b   :  { %v243_v6 = vmul.f32 0.5, %v242_v5 }
 0x76d   :  { %v245_v11 = vmul.f32 %v243_v6, %v203_v58 }
 0x7d9   :  { %v248_v9 = vpop.permute.xlu1 %247 }
 0x7da   :  { %v250_v10 = vmul.f32 %v248_v9, %v243_v6 }
 0x7dc   :  { %252 = vrot.lane.b32.xlu2 %v250_v10, %s1191_s21 }
 0x7e4   :  { %45 = vperm.xlu2 %1092, %v37_v17  }
 0x836   :  { %v253_v12 = vpop.permute.xlu2 %252 }
 0x837   :  { %v255_v13 = vadd.f32 %v253_v12, %v245_v11 }
 0x839   :  { %1133 = vtanh.f32 %v255_v13 }
 0x83e   :  { %v46_v19 = vpop.permute.xlu2 %45 }
 0x83f   :  { %v1134_v14 = vpop.eup %1133  ;;  %v50_v20 = vmul.f32 %v1218_v7, %v46_v19 }
 0x840   :  { %258 = vrot.lane.b32.xlu0 %v1134_v14, %s1190_s2 }
 0x841   :  { %v53_v21 = vadd.f32 %v1220_v8, %v50_v20 }
 0x843   :  { %55 = vst [vmem:[#allocation2 + $0x8] sm:$0xff] %v53_v21 }
 0x84a   :  { %v268_v22 = vld [vmem:[#allocation2 + $0x8] sm:$0x3]  ;;  %v320_v37 = vld [vmem:[#allocation2 + $0xa] sm:$0x3]  ;;  %v372_v54 = vld [vmem:[#allocation2 + $0xc] sm:$0x3] }
 0x84b   :  { %v424_v9 = vld [vmem:[#allocation2 + $0xe] sm:$0x3] }
 0x8b2   :  { %v259_v15 = vpop.permute.xlu0 %258 }
 0x8b3   :  { %v261_v16 = vmul.f32 %v259_v15, %v243_v6 }
 0x8b5   :  { %263 = vrot.lane.b32.xlu1 %v261_v16, %s1191_s21 }
 0x927   :  { %v264_v18 = vpop.permute.xlu1 %263 }
 0x928   :  { %266 = vst.msk [vmem:[#allocation3 + $0x3] sm:$0x1] %vm108_vm0, %v264_v18  ;;  %1058 = vmatmul.msk.f32.vlgmr.msra.gmra.mxu0 %vm57_vm1, %v264_v18 }
 0x929   :  { %267 = vst.msk [vmem:[#allocation3 + $0xa] sm:$0x2] %vm110_vm2, %v264_v18 }
 0x9a5   :  { %v288_v23 = vpop.f32.mrf.mxu0 }
 0x9a6   :  { %v291_v24 = vadd.f32 %v288_v23, %v268_v22 }
 0x9a8   :  { %1135 = vtanh.f32 %v291_v24  ;;  %v292_v26 = vmul.f32 0.5, %v291_v24 }
 0x9aa   :  { %1137 = vtanh.f32 %v292_v26  ;;  %v579_v26 = vld [vmem:[#allocation4 + $0x40] sm:$0xff] }
 0x9ae   :  { %v1136_v25 = vpop.eup %1135 }
 0x9af   :  { %299 = vrot.lane.b32.xlu0 %v1136_v25, %s1190_s2  ;;  %v580_v25 = vld [vmem:[#allocation4 + $0x48] sm:$0xff] }
 0x9b0   :  { %v1138_v27 = vpop.eup %1137  ;;  %601 = vmatpush.msra.mxu3 %v580_v25 }
 0x9b1   :  { %v294_v28 = vadd.f32 1.0, %v1138_v27  ;;  %v482_v27 = vld [vmem:[#allocation4 + $0x100] sm:$0xff] }
 0x9b2   :  { %500 = vmatpush.msrb.mxu0 %v482_v27  ;;  %602 = vmatpush.msra.mxu3 %v579_v26  ;;  %v1099_v27 = vld [vmem:[#allocation4 + $0x198] ss:$0 sm:$0xff] }
 0x9b3   :  { %v295_v29 = vmul.f32 0.5, %v294_v28  ;;  %v481_v28 = vld [vmem:[#allocation4 + $0xf8] sm:$0xff] }
 0x9b4   :  { %501 = vmatpush.msrb.mxu0 %v481_v28 }
 0x9b5   :  { %v297_v7 = vmul.f32 %v295_v29, %v255_v13 }
 0xa21   :  { %v300_v30 = vpop.permute.xlu0 %299 }
 0xa22   :  { %v302_v31 = vmul.f32 %v300_v30, %v295_v29  ;;  %v577_v30 = vld [vmem:[#allocation4 + $0x30] sm:$0xff] }
 0xa24   :  { %304 = vrot.lane.b32.xlu1 %v302_v31, %s1191_s21  ;;  %v480_v31 = vld [vmem:[#allocation4 + $0xf0] sm:$0xff] }
 0xa25   :  { %502 = vmatpush.msrb.mxu0 %v480_v31  ;;  %v728_v31 = vld [vmem:[#allocation4 + $0x260] sm:$0xff] }
 0xa96   :  { %v305_v32 = vpop.permute.xlu1 %304 }
 0xa97   :  { %v307_v8 = vadd.f32 %v305_v32, %v297_v7  ;;  %v479_v7 = vld [vmem:[#allocation4 + $0xe8] sm:$0xff]  ;;  %v1285_v32 = vld [vmem:[%s1340_s1] sm:$0x3] }
 0xa98   :  { %503 = vmatpush.msrb.mxu0 %v479_v7 }
 0xa99   :  { %1139 = vtanh.f32 %v307_v8  ;;  %1062 = vmatmul.msk.f32.vlgmr.msrb.gmra.mxu0 %vm57_vm1, %v1285_v32 }
 0xa9f   :  { %v1140_v33 = vpop.eup %1139 }
 0xaa0   :  { %310 = vrot.lane.b32.xlu2 %v1140_v33, %s1190_s2  ;;  %v515_v33 = vld [vmem:[#allocation4 + $0x140] sm:$0xff] }
 0xafa   :  { %v311_v34 = vpop.permute.xlu2 %310 }
 0xafb   :  { %v313_v35 = vmul.f32 %v311_v34, %v295_v29  ;;  %v578_v29 = vld [vmem:[#allocation4 + $0x38] sm:$0xff]  ;;  %v621_v34 = vld [vmem:[#allocation4 + $0x90] sm:$0xff] }
 0xafc   :  { %603 = vmatpush.msra.mxu3 %v578_v29  ;;  %638 = vmatpush.msra.mxu0 %v621_v34  ;;  %v730_v29 = vld [vmem:[#allocation4 + $0x270] sm:$0xff] }
 0xafd   :  { %315 = vrot.lane.b32.xlu0 %v313_v35, %s1191_s21  ;;  %v620_v35 = vld [vmem:[#allocation4 + $0x88] sm:$0xff] }
 0xafe   :  { %604 = vmatpush.msra.mxu3 %v577_v30  ;;  %639 = vmatpush.msra.mxu0 %v620_v35  ;;  %v729_v30 = vld [vmem:[#allocation4 + $0x268] sm:$0xff]  ;;  %v827_v35 = vld [vmem:[#allocation4 + $0x1b8] sm:$0xff] }
 0xb6f   :  { %v316_v36 = vpop.permute.xlu0 %315 }
 0xb70   :  { %318 = vst.msk [vmem:[#allocation3 + $0x4] sm:$0x1] %vm108_vm0, %v316_v36  ;;  %1059 = vmatmul.msk.f32.vlgmr.msrb.gmra.mxu1 %vm57_vm1, %v316_v36 }
 0xb71   :  { %319 = vst.msk [vmem:[#allocation3 + $0xb] sm:$0x2] %vm110_vm2, %v316_v36  ;;  %v514_v36 = vld [vmem:[#allocation4 + $0x138] sm:$0xff] }
 0xbed   :  { %v340_v38 = vpop.f32.mrf.mxu1 }
 0xbee   :  { %v343_v39 = vadd.f32 %v340_v38, %v320_v37  ;;  %v619_v37 = vld [vmem:[#allocation4 + $0x80] sm:$0xff]  ;;  %v513_v38 = vld [vmem:[#allocation4 + $0x130] sm:$0xff] }
 0xbef   :  { %640 = vmatpush.msra.mxu0 %v619_v37 }
 0xbf0   :  { %1141 = vtanh.f32 %v343_v39  ;;  %v344_v41 = vmul.f32 0.5, %v343_v39  ;;  %v618_v39 = vld [vmem:[#allocation4 + $0x78] sm:$0xff] }
 0xbf1   :  { %641 = vmatpush.msra.mxu0 %v618_v39  ;;  %v825_v39 = vld [vmem:[#allocation4 + $0x1a8] sm:$0xff] }
 0xbf2   :  { %1143 = vtanh.f32 %v344_v41 }
 0xbf6   :  { %v1142_v40 = vpop.eup %1141 }
 0xbf7   :  { %351 = vrot.lane.b32.xlu1 %v1142_v40, %s1190_s2  ;;  %v512_v40 = vld [vmem:[#allocation4 + $0x128] sm:$0xff] }
 0xbf8   :  { %v1144_v42 = vpop.eup %1143 }
 0xbf9   :  { %v346_v43 = vadd.f32 1.0, %v1144_v42 }
 0xbfb   :  { %v347_v44 = vmul.f32 0.5, %v346_v43 }
 0xbfd   :  { %v349_v47 = vmul.f32 %v347_v44, %v307_v8  ;;  %v516_v8 = vld [vmem:[#allocation4 + $0x148] sm:$0xff] }
 0xbfe   :  { %531 = vmatpush.msra.mxu1 %v516_v8  ;;  %v727_v8 = vld [vmem:[#allocation4 + $0x258] sm:$0xff] }
 0xc00   :  { %532 = vmatpush.msra.mxu1 %v515_v33  ;;  %v1100_v33 = vld [vmem:[#allocation4 + $0xe0] ss:$0 sm:$0xff] }
 0xc02   :  { %533 = vmatpush.msra.mxu1 %v514_v36  ;;  %v826_v36 = vld [vmem:[#allocation4 + $0x1b0] sm:$0xff] }
 0xc04   :  { %534 = vmatpush.msra.mxu1 %v513_v38 }
 0xc06   :  { %535 = vmatpush.msra.mxu1 %v512_v40 }
 0xc69   :  { %v352_v45 = vpop.permute.xlu1 %351 }
 0xc6a   :  { %v354_v46 = vmul.f32 %v352_v45, %v347_v44  ;;  %v617_v45 = vld [vmem:[#allocation4 + $0x70] sm:$0xff] }
 0xc6b   :  { %642 = vmatpush.msra.mxu0 %v617_v45 }
 0xc6c   :  { %356 = vrot.lane.b32.xlu2 %v354_v46, %s1191_s21  ;;  %v510_v46 = vld [vmem:[#allocation4 + $0x118] sm:$0xff] }
 0xcc6   :  { %v357_v48 = vpop.permute.xlu2 %356 }
 0xcc7   :  { %v359_v49 = vadd.f32 %v357_v48, %v349_v47  ;;  %v1095_v47 = vld [vmem:[#allocation4 + $0x108] ss:$0 sm:$0xff]  ;;  %v505_v48 = vpop.f32.mrf.mxu0 }
 0xcc9   :  { %1145 = vtanh.f32 %v359_v49 }
 0xccf   :  { %v1146_v50 = vpop.eup %1145 }
 0xcd0   :  { %362 = vrot.lane.b32.xlu0 %v1146_v50, %s1190_s2  ;;  %v616_v50 = vld [vmem:[#allocation4 + $0x68] sm:$0xff] }
 0xcd1   :  { %643 = vmatpush.msra.mxu0 %v616_v50 }
 0xd42   :  { %v363_v51 = vpop.permute.xlu0 %362 }
 0xd43   :  { %v365_v52 = vmul.f32 %v363_v51, %v347_v44  ;;  %v511_v44 = vld [vmem:[#allocation4 + $0x120] sm:$0xff] }
 0xd44   :  { %536 = vmatpush.msra.mxu1 %v511_v44  ;;  %v824_v44 = vld [vmem:[#allocation4 + $0x1a0] sm:$0xff] }
 0xd45   :  { %367 = vrot.lane.b32.xlu1 %v365_v52, %s1191_s21  ;;  %v509_v52 = vld [vmem:[#allocation4 + $0x110] sm:$0xff] }
 0xd46   :  { %537 = vmatpush.msra.mxu1 %v510_v46 }
 0xd48   :  { %538 = vmatpush.msra.mxu1 %v509_v52 }
 0xd4a   :  { %748 = vmatpush.msrb.mxu1 %v730_v29 }
 0xd4c   :  { %749 = vmatpush.msrb.mxu1 %v729_v30 }
 0xd4e   :  { %750 = vmatpush.msrb.mxu1 %v728_v31 }
 0xd50   :  { %751 = vmatpush.msrb.mxu1 %v727_v8 }
 0xdb7   :  { %v368_v53 = vpop.permute.xlu1 %367 }
 0xdb8   :  { %370 = vst.msk [vmem:[#allocation3 + $0x5] sm:$0x1] %vm108_vm0, %v368_v53  ;;  %1060 = vmatmul.msk.f32.vlgmr.msra.gmra.mxu2 %vm57_vm1, %v368_v53 }
 0xdb9   :  { %371 = vst.msk [vmem:[#allocation3 + $0xc] sm:$0x2] %vm110_vm2, %v368_v53  ;;  %v615_v53 = vld [vmem:[#allocation4 + $0x60] sm:$0xff] }
 0xdba   :  { %644 = vmatpush.msra.mxu0 %v615_v53 }
 0xe3b   :  { %v392_v55 = vpop.f32.mrf.mxu2 }
 0xe3c   :  { %v395_v56 = vadd.f32 %v392_v55, %v372_v54  ;;  %v614_v54 = vld [vmem:[#allocation4 + $0x58] sm:$0xff]  ;;  %v551_v55 = vld [vmem:[#allocation4 + $0x190] sm:$0xff] }
 0xe3d   :  { %645 = vmatpush.msra.mxu0 %v614_v54  ;;  %565 = vmatpush.msrb.mxu2 %v551_v55  ;;  %v764_v55 = vld [vmem:[#allocation4 + $0x2b8] sm:$0xff] }
 0xe3e   :  { %1147 = vtanh.f32 %v395_v56  ;;  %v396_v58 = vmul.f32 0.5, %v395_v56  ;;  %v662_v56 = vld [vmem:[#allocation4 + $0xd8] sm:$0xff] }
 0xe40   :  { %1149 = vtanh.f32 %v396_v58  ;;  %v661_v58 = vld [vmem:[#allocation4 + $0xd0] sm:$0xff] }
 0xe44   :  { %v1148_v57 = vpop.eup %1147 }
 0xe45   :  { %403 = vrot.lane.b32.xlu2 %v1148_v57, %s1190_s2  ;;  %v550_v57 = vld [vmem:[#allocation4 + $0x188] sm:$0xff] }
 0xe46   :  { %v1150_v59 = vpop.eup %1149  ;;  %566 = vmatpush.msrb.mxu2 %v550_v57 }
 0xe47   :  { %v398_v60 = vadd.f32 1.0, %v1150_v59  ;;  %v549_v59 = vld [vmem:[#allocation4 + $0x180] sm:$0xff] }
 0xe48   :  { %567 = vmatpush.msrb.mxu2 %v549_v59  ;;  %v868_v59 = vld [vmem:[#allocation4 + $0x200] sm:$0xff] }
 0xe49   :  { %v399_v61 = vmul.f32 0.5, %v398_v60  ;;  %v660_v60 = vld [vmem:[#allocation4 + $0xc8] sm:$0xff] }
 0xe4b   :  { %v401_v0 = vmul.f32 %v399_v61, %v359_v49  ;;  %v506_v49 = vadd.f32 %v1095_v47, %v505_v48 }
 0xe4d   :  { %v508_v51 = vmax.f32 %v506_v49, 0.0 }
 0xe4f   :  { %1063 = vmatmul.msk.f32.vlgmr.msra.gmra.mxu1 %vm519_vm3, %v508_v51 }
 0xe50   :  { %848 = vmatpush.msra.mxu1 %v827_v35 }
 0xe52   :  { %849 = vmatpush.msra.mxu1 %v826_v36 }
 0xe54   :  { %850 = vmatpush.msra.mxu1 %v825_v39  ;;  %v907_v39 = vld [vmem:[#allocation4 + $0x238] sm:$0xff] }
 0xe56   :  { %851 = vmatpush.msra.mxu1 %v824_v44  ;;  %v791_v44 = vld [vmem:[#allocation4 + $0x2c8] sm:$0xff] }
 0xe9f   :  { %v404_v62 = vpop.permute.xlu2 %403 }
 0xea0   :  { %v406_v63 = vmul.f32 %v404_v62, %v399_v61  ;;  %v659_v62 = vld [vmem:[#allocation4 + $0xc0] sm:$0xff] }
 0xea2   :  { %408 = vrot.lane.b32.xlu0 %v406_v63, %s1191_s21  ;;  %v547_v63 = vld [vmem:[#allocation4 + $0x170] sm:$0xff] }
 0xf14   :  { %v409_v1 = vpop.permute.xlu0 %408 }
 0xf15   :  { %v411_v2 = vadd.f32 %v409_v1, %v401_v0  ;;  %v658_v0 = vld [vmem:[#allocation4 + $0xb8] sm:$0xff]  ;;  %v1096_v1 = vld [vmem:[#allocation4 + $0x50] ss:$0 sm:$0xff] }
 0xf17   :  { %1151 = vtanh.f32 %v411_v2 }
 0xf1d   :  { %v1152_v3 = vpop.eup %1151 }
 0xf1e   :  { %414 = vrot.lane.b32.xlu1 %v1152_v3, %s1190_s2 }
 0xf90   :  { %v415_v4 = vpop.permute.xlu1 %414 }
 0xf91   :  { %v417_v5 = vmul.f32 %v415_v4, %v399_v61  ;;  %v548_v61 = vld [vmem:[#allocation4 + $0x178] sm:$0xff] }
 0xf92   :  { %568 = vmatpush.msrb.mxu2 %v548_v61  ;;  %v867_v61 = vld [vmem:[#allocation4 + $0x1f8] sm:$0xff] }
 0xf93   :  { %419 = vrot.lane.b32.xlu2 %v417_v5, %s1191_s21 }
 0xf94   :  { %569 = vmatpush.msrb.mxu2 %v547_v63  ;;  %v761_v63 = vld [vmem:[#allocation4 + $0x2a0] sm:$0xff] }
 0xfed   :  { %v420_v6 = vpop.permute.xlu2 %419 }
 0xfee   :  { %422 = vst.msk [vmem:[#allocation3 + $0x6] sm:$0x1] %vm108_vm0, %v420_v6  ;;  %1061 = vmatmul.msk.f32.vlgmr.msrb.gmra.mxu3 %vm57_vm1, %v420_v6 }
 0xfef   :  { %423 = vst.msk [vmem:[#allocation3 + $0xd] sm:$0x2] %vm110_vm2, %v420_v6  ;;  %679 = vmatpush.msrb.mxu3 %v662_v56  ;;  %v763_v56 = vld [vmem:[#allocation4 + $0x2b0] sm:$0xff] }
 0xff1   :  { %680 = vmatpush.msrb.mxu3 %v661_v58 }
 0xff3   :  { %681 = vmatpush.msrb.mxu3 %v660_v60  ;;  %v762_v60 = vld [vmem:[#allocation4 + $0x2a8] sm:$0xff] }
 0xff5   :  { %682 = vmatpush.msrb.mxu3 %v659_v62 }
 0xff7   :  { %683 = vmatpush.msrb.mxu3 %v658_v0 }
0x1071   :  { %v444_v10 = vpop.f32.mrf.mxu3 }
0x1072   :  { %v447_v11 = vadd.f32 %v444_v10, %v424_v9  ;;  %v546_v10 = vld [vmem:[#allocation4 + $0x168] sm:$0xff] }
0x1073   :  { %570 = vmatpush.msrb.mxu2 %v546_v10 }
0x1074   :  { %1153 = vtanh.f32 %v447_v11  ;;  %v448_v13 = vmul.f32 0.5, %v447_v11  ;;  %v657_v11 = vld [vmem:[#allocation4 + $0xb0] sm:$0xff] }
0x1075   :  { %684 = vmatpush.msrb.mxu3 %v657_v11 }
0x1076   :  { %1155 = vtanh.f32 %v448_v13  ;;  %v1097_v13 = vld [vmem:[#allocation4 + $0x150] ss:$0 sm:$0xff] }
0x107a   :  { %v1154_v12 = vpop.eup %1153 }
0x107b   :  { %455 = vrot.lane.b32.xlu0 %v1154_v12, %s1190_s2  ;;  %v545_v12 = vld [vmem:[#allocation4 + $0x160] sm:$0xff] }
0x107c   :  { %v1156_v14 = vpop.eup %1155  ;;  %571 = vmatpush.msrb.mxu2 %v545_v12 }
0x107d   :  { %v450_v15 = vadd.f32 1.0, %v1156_v14  ;;  %v540_v14 = vpop.f32.mrf.mxu1 }
0x107f   :  { %v451_v16 = vmul.f32 0.5, %v450_v15  ;;  %v541_v15 = vadd.f32 %v1097_v13, %v540_v14 }
0x1081   :  { %v453_v19 = vmul.f32 %v451_v16, %v411_v2 }
0x10ed   :  { %v456_v17 = vpop.permute.xlu0 %455 }
0x10ee   :  { %v458_v18 = vmul.f32 %v456_v17, %v451_v16  ;;  %v656_v17 = vld [vmem:[#allocation4 + $0xa8] sm:$0xff] }
0x10ef   :  { %685 = vmatpush.msrb.mxu3 %v656_v17  ;;  %v865_v17 = vld [vmem:[#allocation4 + $0x1e8] sm:$0xff] }
0x10f0   :  { %460 = vrot.lane.b32.xlu1 %v458_v18, %s1191_s21  ;;  %v544_v18 = vld [vmem:[#allocation4 + $0x158] sm:$0xff] }
0x10f1   :  { %572 = vmatpush.msrb.mxu2 %v544_v18  ;;  %v864_v18 = vld [vmem:[#allocation4 + $0x1e0] sm:$0xff] }
0x10f3   :  { %778 = vmatpush.msra.mxu2 %v764_v55 }
0x10f5   :  { %779 = vmatpush.msra.mxu2 %v763_v56 }
0x10f7   :  { %780 = vmatpush.msra.mxu2 %v762_v60  ;;  %v958_v60 = vld [vmem:[#allocation4 + $0x328] sm:$0xff] }
0x10f9   :  { %781 = vmatpush.msra.mxu2 %v761_v63  ;;  %v955_v63 = vld [vmem:[#allocation4 + $0x310] sm:$0xff] }
0x1162   :  { %v461_v20 = vpop.permute.xlu1 %460 }
0x1163   :  { %v463_v21 = vadd.f32 %v461_v20, %v453_v19  ;;  %v655_v19 = vld [vmem:[#allocation4 + $0xa0] sm:$0xff]  ;;  %v1098_v20 = vld [vmem:[#allocation4 + $0x98] ss:$0 sm:$0xff] }
0x1164   :  { %686 = vmatpush.msrb.mxu3 %v655_v19  ;;  %v863_v19 = vld [vmem:[#allocation4 + $0x1d8] sm:$0xff] }
0x1165   :  { %1157 = vtanh.f32 %v463_v21 }
0x116b   :  { %v1158_v22 = vpop.eup %1157 }
0x116c   :  { %466 = vrot.lane.b32.xlu2 %v1158_v22, %s1190_s2 }
0x11c6   :  { %v467_v23 = vpop.permute.xlu2 %466 }
0x11c7   :  { %v469_v24 = vmul.f32 %v467_v23, %v451_v16  ;;  %v543_v16 = vmax.f32 %v541_v15, 0.0  ;;  %v759_v15 = vld [vmem:[#allocation4 + $0x290] sm:$0xff] }
0x11c9   :  { %471 = vrot.lane.b32.xlu0 %v469_v24, %s1191_s21  ;;  %1064 = vmatmul.msk.f32.vlgmr.msrb.gmra.mxu2 %vm519_vm3, %v543_v16  ;;  %v758_v16 = vld [vmem:[#allocation4 + $0x288] sm:$0xff] }
0x123b   :  { %v472_v41 = vpop.permute.xlu0 %471 }
0x123c   :  { %474 = vst.msk [vmem:[#allocation3 + $0x7] sm:$0x1] %vm108_vm0, %v472_v41 }
0x123d   :  { %475 = vst.msk [vmem:[#allocation3 + $0xe] sm:$0x2] %vm110_vm2, %v472_v41 }
0x1243   :  { %v1291_v42 = vld [vmem:[#allocation3] sm:$0xff] }
0x1244   :  { %1065 = vmatmul.msk.f32.vlgmr.msra.gmra.mxu3 %vm57_vm1, %v1291_v42  ;;  %v1295_v43 = vld [vmem:[#allocation3 + $0x8] sm:$0xff] }
0x1245   :  { %885 = vmatpush.msra.mxu3 %v868_v59 }
0x1247   :  { %886 = vmatpush.msra.mxu3 %v867_v61  ;;  %v957_v61 = vld [vmem:[#allocation4 + $0x320] sm:$0xff] }
0x124c   :  { %1066 = vmatmul.msk.f32.gmra.mxu3 %vm57_vm1, %v1295_v43  ;;  %v574_v28 = vpop.f32.mrf.mxu2 }
0x124d   :  { %v575_v7 = vadd.f32 %v1099_v27, %v574_v28  ;;  %v794_v27 = vld [vmem:[#allocation4 + $0x2e0] sm:$0xff]  ;;  %v1101_v28 = vld [vmem:[#allocation4 + $0x278] ss:$0 sm:$0xff] }
0x124f   :  { %v696_v34 = vperm.slane %v575_v7, 0  ;;  %v695_v40 = vrot.slane %v575_v7, 1  ;;  %v1102_v7 = vld [vmem:[#allocation4 + $0x1c0] ss:$0 sm:$0xff] }
0x1251   :  { %v697_v47 = vperm.slane %v695_v40, 0  ;;  %v792_v40 = vld [vmem:[#allocation4 + $0x2d0] sm:$0xff] }
0x12c7   :  { %v606_v2 = vpop.f32.mrf.mxu3 }
0x12c8   :  { %v607_v3 = vadd.f32 %v1096_v1, %v606_v2  ;;  %v760_v2 = vld [vmem:[#allocation4 + $0x298] sm:$0xff] }
0x12c9   :  { %782 = vmatpush.msra.mxu2 %v760_v2  ;;  %v997_v2 = vld [vmem:[#allocation4 + $0x360] sm:$0xff] }
0x12ca   :  { %v612_v4 = vmax.f32 %v607_v3, 0.0 }
0x12cb   :  { %783 = vmatpush.msra.mxu2 %v759_v15 }
0x12cc   :  { %1067 = vmatmul.msk.f32.vlgmr.msra.gmra.mxu0 %vm519_vm3, %v612_v4 }
0x12cd   :  { %784 = vmatpush.msra.mxu2 %v758_v16 }
0x12cf   :  { %v609_v5 = vpop.f32.mrf.mxu3 }
0x12d0   :  { %v610_v6 = vadd.f32 %v1096_v1, %v609_v5 }
0x12d2   :  { %v613_v9 = vmax.f32 %v610_v6, 0.0 }
0x12d4   :  { %1068 = vmatmul.msk.f32.gmra.mxu0 %vm519_vm3, %v613_v9 }
0x1349   :  { %v647_v21 = vpop.f32.mrf.mxu0 }
0x134a   :  { %v648_v22 = vadd.f32 %v1098_v20, %v647_v21  ;;  %v798_v21 = vld [vmem:[#allocation4 + $0x300] sm:$0xff] }
0x134b   :  { %812 = vmatpush.msrb.mxu0 %v798_v21 }
0x134c   :  { %v653_v23 = vmax.f32 %v648_v22, 0.0  ;;  %v797_v22 = vld [vmem:[#allocation4 + $0x2f8] sm:$0xff] }
0x134d   :  { %813 = vmatpush.msrb.mxu0 %v797_v22 }
0x134e   :  { %1069 = vmatmul.msk.f32.vlgmr.msrb.gmra.mxu3 %vm519_vm3, %v653_v23  ;;  %v909_v23 = vld [vmem:[#allocation4 + $0x248] sm:$0xff] }
0x1351   :  { %v650_v24 = vpop.f32.mrf.mxu0 }
0x1352   :  { %v651_v25 = vadd.f32 %v1098_v20, %v650_v24  ;;  %v861_v20 = vld [vmem:[#allocation4 + $0x1c8] sm:$0xff]  ;;  %v796_v24 = vld [vmem:[#allocation4 + $0x2f0] sm:$0xff] }
0x1353   :  { %814 = vmatpush.msrb.mxu0 %v796_v24 }
0x1354   :  { %v654_v26 = vmax.f32 %v651_v25, 0.0  ;;  %v908_v25 = vld [vmem:[#allocation4 + $0x240] sm:$0xff] }
0x1356   :  { %1070 = vmatmul.msk.f32.gmra.mxu3 %vm519_vm3, %v654_v26  ;;  %v795_v26 = vld [vmem:[#allocation4 + $0x2e8] sm:$0xff] }
0x1357   :  { %815 = vmatpush.msrb.mxu0 %v795_v26  ;;  %v993_v26 = vld [vmem:[#allocation4 + $0x340] sm:$0xff] }
0x1359   :  { %816 = vmatpush.msrb.mxu0 %v794_v27  ;;  %v1107_v27 = vld [vmem:[#allocation4 + $0x330] ss:$0 sm:$0xff] }
0x13d1   :  { %v688_v37 = vpop.f32.mrf.mxu3 }
0x13d2   :  { %v689_v38 = vadd.f32 %v1100_v33, %v688_v37 }
0x13d4   :  { %v700_v41 = vmul.f32 %v696_v34, %v689_v38  ;;  %v793_v38 = vld [vmem:[#allocation4 + $0x2d8] sm:$0xff] }
0x13d5   :  { %817 = vmatpush.msrb.mxu0 %v793_v38 }
0x13d6   :  { %v702_v45 = vsel %vm57_vm1, %v700_v41, -inf  ;;  %v716_v11 = vadd.f32 %v700_v41, %v1291_v42  ;;  %v757_v42 = vld [vmem:[#allocation4 + $0x280] sm:$0xff]  ;;  %v906_v41 = vld [vmem:[#allocation4 + $0x230] sm:$0xff] }
0x13d7   :  { %v703_v46 = vrot.slane %v702_v45, 4  ;;  %785 = vmatpush.msra.mxu2 %v757_v42  ;;  %818 = vmatpush.msrb.mxu0 %v792_v40 }
0x13d8   :  { %v1310_v12 = vmul.f32 0.5, %v716_v11 }
0x13d9   :  { %v704_v48 = vmax.f32 %v702_v45, %v703_v46  ;;  %v691_v49 = vpop.f32.mrf.mxu3  ;;  %819 = vmatpush.msrb.mxu0 %v791_v44  ;;  %v905_v45 = vld [vmem:[#allocation4 + $0x228] sm:$0xff]  ;;  %v904_v46 = vld [vmem:[#allocation4 + $0x220] sm:$0xff]  ;;  %979 = vmatpush.msrb.mxu2 %v958_v60 }
0x13da   :  { %v692_v50 = vadd.f32 %v1100_v33, %v691_v49  ;;  %v1103_v49 = vld [vmem:[#allocation4 + $0x2c0] ss:$0 sm:$0xff]  ;;  %v949_v16 = vmul.f32 2.0, %v1310_v12 }
0x13db   :  { %v705_v52 = vrot.slane %v704_v48, 2  ;;  %980 = vmatpush.msrb.mxu2 %v957_v61 }
0x13dc   :  { %v701_v51 = vmul.f32 %v697_v47, %v692_v50  ;;  %v903_v47 = vld [vmem:[#allocation4 + $0x218] sm:$0xff] }
0x13dd   :  { %v706_v57 = vmax.f32 %v704_v48, %v705_v52  ;;  %v902_v48 = vld [vmem:[#allocation4 + $0x210] sm:$0xff] }
0x13de   :  { %v709_v53 = vsel %vm57_vm1, %v701_v51, -inf  ;;  %v717_v13 = vadd.f32 %v701_v51, %v1295_v43  ;;  %v862_v43 = vld [vmem:[#allocation4 + $0x1d0] sm:$0xff] }
0x13df   :  { %v710_v54 = vrot.slane %v709_v53, 4  ;;  %v707_v0 = vrot.slane %v706_v57, 1 }
0x13e0   :  { %v1315_v14 = vmul.f32 0.5, %v717_v13 }
0x13e1   :  { %v711_v58 = vmax.f32 %v709_v53, %v710_v54  ;;  %v708_v4 = vmax.f32 %v706_v57, %v707_v0  ;;  %v1104_v53 = vld [vmem:[#allocation4 + $0x208] ss:$0 sm:$0xff]  ;;  %v999_v0 = vld [vmem:[#allocation4 + $0x370] sm:$0xff] }
0x13e2   :  { %1016 = vmatpush.msra.mxu0 %v999_v0  ;;  %v950_v21 = vmul.f32 2.0, %v1315_v14 }
0x13e3   :  { %v712_v62 = vrot.slane %v711_v58, 2 }
0x13e5   :  { %v713_v1 = vmax.f32 %v711_v58, %v712_v62  ;;  %v956_v62 = vld [vmem:[#allocation4 + $0x318] sm:$0xff] }
0x13e6   :  { %981 = vmatpush.msrb.mxu2 %v956_v62 }
0x13e7   :  { %v714_v3 = vrot.slane %v713_v1, 1 }
0x13e8   :  { %982 = vmatpush.msrb.mxu2 %v955_v63 }
0x13e9   :  { %v715_v5 = vmax.f32 %v713_v1, %v714_v3  ;;  %v998_v1 = vld [vmem:[#allocation4 + $0x368] sm:$0xff]  ;;  %v996_v3 = vld [vmem:[#allocation4 + $0x358] sm:$0xff] }
0x13ea   :  { %1017 = vmatpush.msra.mxu0 %v998_v1 }
0x13eb   :  { %v723_v6 = vsel %vm722_vm4, %v715_v5, %v708_v4  ;;  %v995_v4 = vld [vmem:[#allocation4 + $0x350] sm:$0xff]  ;;  %v1105_v5 = vld [vmem:[#allocation4 + $0x308] ss:$0 sm:$0xff] }
0x13ec   :  { %v725_v9 = vadd.f32 %v723_v6, %v1285_v32  ;;  %v866_v32 = vld [vmem:[#allocation4 + $0x1f0] sm:$0xff]  ;;  %1018 = vmatpush.msra.mxu0 %v997_v2 }
0x13ed   :  { %887 = vmatpush.msra.mxu3 %v866_v32 }
0x13ee   :  { %v726_v10 = vmul.f32 0.5, %v725_v9  ;;  %1019 = vmatpush.msra.mxu0 %v996_v3 }
0x13ef   :  { %888 = vmatpush.msra.mxu3 %v865_v17 }
0x13f0   :  { %1071 = vmatmul.msk.f32.vlgmr.msrb.gmra.mxu1 %vm57_vm1, %v726_v10  ;;  %1020 = vmatpush.msra.mxu0 %v995_v4  ;;  %v1106_v10 = vld [vmem:[#allocation4 + $0x250] ss:$0 sm:$0xff] }
0x13f1   :  { %889 = vmatpush.msra.mxu3 %v864_v18  ;;  %926 = vmatpush.msrb.mxu1 %v909_v23 }
0x13f3   :  { %890 = vmatpush.msra.mxu3 %v863_v19  ;;  %927 = vmatpush.msrb.mxu1 %v908_v25  ;;  %v994_v25 = vld [vmem:[#allocation4 + $0x348] sm:$0xff] }
0x13f4   :  { %1021 = vmatpush.msra.mxu0 %v994_v25 }
0x13f5   :  { %891 = vmatpush.msra.mxu3 %v862_v43  ;;  %928 = vmatpush.msrb.mxu1 %v907_v39 }
0x13f6   :  { %1022 = vmatpush.msra.mxu0 %v993_v26 }
0x13f7   :  { %892 = vmatpush.msra.mxu3 %v861_v20  ;;  %929 = vmatpush.msrb.mxu1 %v906_v41 }
0x13f8   :  { %1074 = vmatmul.msk.f32.vlgmr.msra.gmra.mxu1 %vm57_vm1, %v1310_v12  ;;  %v992_v12 = vld [vmem:[#allocation4 + $0x338] sm:$0xff] }
0x13f9   :  { %930 = vmatpush.msrb.mxu1 %v905_v45  ;;  %1023 = vmatpush.msra.mxu0 %v992_v12 }
0x13fb   :  { %931 = vmatpush.msrb.mxu1 %v904_v46  ;;  %v1110_v46 = vld [vmem:[#allocation4 + $0x388] ss:$0 sm:$0xff] }
0x13fd   :  { %932 = vmatpush.msrb.mxu1 %v903_v47 }
0x13ff   :  { %933 = vmatpush.msrb.mxu1 %v902_v48 }
0x1400   :  { %1075 = vmatmul.msk.f32.gmra.mxu1 %vm57_vm1, %v1315_v14 }
0x146d   :  { %v753_v29 = vpop.f32.mrf.mxu1 }
0x146e   :  { %v754_v30 = vadd.f32 %v1101_v28, %v753_v29 }
0x1470   :  { %v756_v31 = vmax.f32 %v754_v30, 0.0 }
0x1472   :  { %1072 = vmatmul.msk.f32.vlgmr.msra.gmra.mxu2 %vm519_vm3, %v756_v31 }
0x1475   :  { %v853_v8 = vpop.f32.mrf.mxu1 }
0x1476   :  { %v854_v33 = vadd.f32 %v1102_v7, %v853_v8  ;;  %v1108_v8 = vld [vmem:[#allocation4 + $0x378] ss:$0 sm:$0xff] }
0x1478   :  { %v859_v34 = vmax.f32 %v854_v33, 0.0 }
0x147a   :  { %1076 = vmatmul.msk.f32.vlgmr.msra.gmra.mxu3 %vm519_vm3, %v859_v34 }
0x147d   :  { %v856_v35 = vpop.f32.mrf.mxu1 }
0x147e   :  { %v857_v36 = vadd.f32 %v1102_v7, %v856_v35  ;;  %v1109_v35 = vld [vmem:[#allocation4 + $0x380] ss:$0 sm:$0xff] }
0x1480   :  { %v860_v37 = vmax.f32 %v857_v36, 0.0 }
0x1482   :  { %1077 = vmatmul.msk.f32.gmra.mxu3 %vm519_vm3, %v860_v37 }
0x14f5   :  { %v787_v50 = vpop.f32.mrf.mxu2 }
0x14f6   :  { %v788_v51 = vadd.f32 %v1103_v49, %v787_v50 }
0x14f8   :  { %v790_v52 = vmax.f32 %v788_v51, 0.0 }
0x14fa   :  { %1073 = vmatmul.msk.f32.vlgmr.msrb.gmra.mxu0 %vm519_vm3, %v790_v52 }
0x14fd   :  { %v894_v54 = vpop.f32.mrf.mxu3 }
0x14fe   :  { %v895_v55 = vadd.f32 %v1104_v53, %v894_v54 }
0x1500   :  { %v900_v56 = vmax.f32 %v895_v55, 0.0 }
0x1502   :  { %1078 = vmatmul.msk.f32.vlgmr.msrb.gmra.mxu1 %vm519_vm3, %v900_v56 }
0x1505   :  { %v897_v57 = vpop.f32.mrf.mxu3 }
0x1506   :  { %v898_v58 = vadd.f32 %v1104_v53, %v897_v57 }
0x1508   :  { %v901_v59 = vmax.f32 %v898_v58, 0.0 }
0x150a   :  { %1079 = vmatmul.msk.f32.gmra.mxu1 %vm519_vm3, %v901_v59 }
0x1577   :  { %v821_v6 = vpop.f32.mrf.mxu0 }
0x1578   :  { %v822_v9 = vadd.f32 %v1105_v5, %v821_v6 }
0x157a   :  { %v943_v13 = vperm.slane %v822_v9, 0  ;;  %v942_v17 = vrot.slane %v822_v9, 1 }
0x157c   :  { %v944_v43 = vperm.slane %v942_v17, 0 }
0x157f   :  { %v935_v11 = vpop.f32.mrf.mxu1 }
0x1580   :  { %v936_v15 = vadd.f32 %v1106_v10, %v935_v11 }
0x1582   :  { %v947_v32 = vmul.f32 %v943_v13, %v936_v15 }
0x1584   :  { %v951_v42 = vadd.f32 %v949_v16, %v947_v32 }
0x1586   :  { %v953_v18 = vmul.f32 0.33333334, %v951_v42 }
0x1587   :  { %v938_v19 = vpop.f32.mrf.mxu1 }
0x1588   :  { %v939_v20 = vadd.f32 %v1106_v10, %v938_v19  ;;  %1080 = vmatmul.msk.f32.vlgmr.msrb.gmra.mxu2 %vm57_vm1, %v953_v18 }
0x158a   :  { %v948_v22 = vmul.f32 %v944_v43, %v939_v20 }
0x158c   :  { %v952_v23 = vadd.f32 %v950_v21, %v948_v22 }
0x158e   :  { %v954_v24 = vmul.f32 0.33333334, %v952_v23 }
0x1590   :  { %1081 = vmatmul.msk.f32.gmra.mxu2 %vm57_vm1, %v954_v24 }
0x160b   :  { %v984_v28 = vpop.f32.mrf.mxu2 }
0x160c   :  { %v985_v29 = vadd.f32 %v1107_v27, %v984_v28 }
0x160e   :  { %v990_v30 = vmax.f32 %v985_v29, 0.0 }
0x1610   :  { %1082 = vmatmul.msk.f32.vlgmr.msra.gmra.mxu0 %vm519_vm3, %v990_v30 }
0x1613   :  { %v987_v31 = vpop.f32.mrf.mxu2 }
0x1614   :  { %v988_v7 = vadd.f32 %v1107_v27, %v987_v31 }
0x1616   :  { %v991_v14 = vmax.f32 %v988_v7, 0.0 }
0x1618   :  { %1083 = vmatmul.msk.f32.gmra.mxu0 %vm519_vm3, %v991_v14 }
0x168d   :  { %v1025_v33 = vpop.f32.mrf.mxu0 }
0x168e   :  { %v1026_v34 = vadd.f32 %v1108_v8, %v1025_v33 }
0x1690   :  { %v1031_v36 = vmax.f32 %v1026_v34, 0.0 }
0x1692   :  { %v1035_v37 = vmul.f32 %v1109_v35, %v1031_v36 }
0x1694   :  { %v1037_v38 = vsel %vm57_vm1, %v1035_v37, 0.0 }
0x1695   :  { %1038 = vadd.xlane.f32.xlu1 %v1037_v38  ;;  %v1028_v39 = vpop.f32.mrf.mxu0 }
0x1696   :  { %v1029_v40 = vadd.f32 %v1108_v8, %v1028_v39 }
0x1698   :  { %v1032_v41 = vmax.f32 %v1029_v40, 0.0 }
0x169a   :  { %v1036_v44 = vmul.f32 %v1109_v35, %v1032_v41 }
0x169c   :  { %v1040_v45 = vsel %vm57_vm1, %v1036_v44, 0.0 }
0x169d   :  { %1041 = vadd.xlane.f32.xlu2 %v1040_v45 }
0x1708   :  { %v1039_v47 = vpop.xlane.xlu1 %1038 }
0x1709   :  { %v1045_v48 = vadd.f32 %v1110_v46, %v1039_v47 }
0x170b   :  { %1048 = vst.msk [vmem:[%s1342_s3] sm:$0xff] %vm1047_vm5, %v1045_v48 }
0x1710   :  { %v1042_v49 = vpop.xlane.xlu2 %1041 }
0x1711   :  { %v1046_v50 = vadd.f32 %v1110_v46, %v1042_v49 }
0x1713   :  { %1049 = vst.msk [vmem:[%s1342_s3 + $0x8] sm:$0xff] %vm1047_vm5, %v1046_v50 }
0x1714   :  { %1054 = vsyncpa [#allocation5], 1 }

</bundles_post_ra>
